<compile_context>
chip_gen: v7x
topology: tpu7x:2x2x1
jax: 0.10.0
libtpu: 0.0.40
codegen_flags: <defaults>
</compile_context>

<pallas_src>
import functools

import jax
import jax.numpy as jnp
from jax.experimental import pallas as pl
from jax.experimental.pallas import tpu as pltpu

NL = 3       # nl=3 layers of (PosLinear(1,1) -> Softplus)
LANES = 128  # vreg lane width


def func_kernel(w_ref, b_ref, x_ref, o_ref):
    # w_ref, b_ref: (NL,) f32 scalars in SMEM (scalar prefetch)
    # x_ref, o_ref: (tile_rows, 128) f32 in VMEM
    x = x_ref[...]
    for i in range(NL):  # static unroll over the nl layers
        # PosLinear(1, 1): raw positive weight used directly (matches the
        # module's f_inverse, which inverts with x = (x - b) / w).
        y = x * w_ref[i] + b_ref[i]
        # Stable softplus: exactly one exp + one log1p per layer (EUP-bound).
        x = jnp.maximum(y, 0.0) + jnp.log1p(jnp.exp(-jnp.abs(y)))
    o_ref[...] = x


def _xla_forward(x, weights, biases):
    # Pure-JAX forward: tiny-batch fast path and correctness reference.
    y = x
    for i in range(NL):
        y = jax.nn.softplus(y * weights[i] + biases[i])
    return y


@functools.partial(jax.jit, static_argnames=("block_rows", "min_pallas_elems"))
def func_model(x, weights, biases, *, block_rows=1024, min_pallas_elems=16384):
    """x: (B, 1) f32 (any f32 array works); weights, biases: (NL,) f32."""
    n = x.size
    if n < min_pallas_elems:
        # Below ~one tile of work the pallas_call launch dominates; a single
        # fused XLA elementwise is as fast or faster.
        return _xla_forward(x, weights, biases)

    # Lane-dense repack: flatten to (rows, 128).  Pad only to the next
    # multiple of 128 when ragged; otherwise this is a free reshape.
    rows = pl.cdiv(n, LANES)
    padded = (n % LANES) != 0
    flat = x.reshape(-1)
    if padded:
        flat = jnp.pad(flat, (0, rows * LANES - n))
    x_tiled = flat.reshape(rows, LANES)

    # Tile rows: multiple of 8, capped at block_rows, and sized so the grid
    # has >= 2 steps whenever possible (v7x megacore sharding of "parallel").
    tb = max(8, min(block_rows, ((pl.cdiv(rows, 2) + 7) // 8) * 8))
    grid = pl.cdiv(rows, tb)  # partial last block is masked by Pallas

    # Donate the repacked buffer only when it is a fresh intermediate (the
    # padded path); aliasing a reshape of the jit parameter would force a
    # defensive copy.
    io_alias = {2: 0} if padded else {}

    out = pl.pallas_call(
        func_kernel,
        out_shape=jax.ShapeDtypeStruct((rows, LANES), jnp.float32),
        grid_spec=pltpu.PrefetchScalarGridSpec(
            num_scalar_prefetch=2,                      # weights, biases -> SMEM
            grid=(grid,),
            in_specs=[pl.BlockSpec((tb, LANES), lambda i, w, b: (i, 0))],
            out_specs=pl.BlockSpec((tb, LANES), lambda i, w, b: (i, 0)),
        ),
        compiler_params=pltpu.CompilerParams(
            dimension_semantics=("parallel",)),
        input_output_aliases=io_alias,
        cost_estimate=pl.CostEstimate(
            flops=18 * n,            # ~6 VALU ops/elem/layer * 3 layers
            transcendentals=6 * n,   # exp + log1p per layer * 3 layers
            bytes_accessed=8 * n),   # read f32 + write f32 (real data)
    )(weights, biases, x_tiled)

    if padded:
        return out.reshape(-1)[:n].reshape(x.shape)
    return out.reshape(x.shape)


if __name__ == "__main__":
    key = jax.random.PRNGKey(0)
    kx, kw = jax.random.split(key)

    # Lane-filling batch that takes the Pallas path (rows=512 -> 2 grid steps,
    # 256 KiB of f32 in / out).
    B = 65536
    x = jax.random.normal(kx, (B, 1), dtype=jnp.float32)

    # Deterministic parameter init mirroring weight_init():
    #  - kaiming_normal for Linear(1,1): std = sqrt(2 / fan_in) = sqrt(2)
    #  - |.| so weights are positive (PosLinear constraint; forward uses raw w)
    #  - biases filled with 0
    weights = jnp.abs(jax.random.normal(kw, (NL,), dtype=jnp.float32)
                      * jnp.sqrt(2.0))
    biases = jnp.zeros((NL,), dtype=jnp.float32)

    out = jax.block_until_ready(func_model(x, weights, biases))
    ref = _xla_forward(x, weights, biases)
    assert out.shape == x.shape
    assert jnp.allclose(out, ref, atol=1e-5, rtol=1e-5)

    # Ragged batch (n % 128 != 0) exercises the pad-to-128 + masked-tail path.
    x_ragged = x[:65000]
    out_r = jax.block_until_ready(func_model(x_ragged, weights, biases))
    assert jnp.allclose(out_r, _xla_forward(x_ragged, weights, biases),
                        atol=1e-5, rtol=1e-5)

    # Tiny batch routes around Pallas (pure-overhead regime) and must match.
    x_small = x[:16]
    out_s = jax.block_until_ready(func_model(x_small, weights, biases))
    assert jnp.allclose(out_s, _xla_forward(x_small, weights, biases),
                        atol=1e-5, rtol=1e-5)

    print("KERNEL_OK")
</pallas_src>

<mosaic_0001>
module attributes {stable_mosaic.version = 11 : i64} {
  func.func @func_kernel(%arg0: i32, %arg1: memref<3xf32, #tpu.memory_space<smem>>, %arg2: memref<3xf32, #tpu.memory_space<smem>>, %arg3: memref<256x128xf32, #tpu.memory_space<vmem>>, %arg4: memref<256x128xf32, #tpu.memory_space<vmem>>) attributes {dimension_semantics = [#tpu.dimension_semantics<parallel>], iteration_bounds = array<i64: 2>, scalar_prefetch = 2 : i64, scratch_operands = 0 : i64, tpu.core_type = #tpu.core_type<tc>, window_params = [{transform_indices = @transform_0, window_bounds = array<i64: 256, 128>}, {transform_indices = @transform_1, window_bounds = array<i64: 256, 128>}]} {
    %c0 = arith.constant 0 : index
    %c0_0 = arith.constant 0 : index
    %0 = vector.load %arg3[%c0, %c0_0] : memref<256x128xf32, #tpu.memory_space<vmem>>, vector<256x128xf32>
    %c0_1 = arith.constant 0 : index
    %1 = memref.load %arg1[%c0_1] : memref<3xf32, #tpu.memory_space<smem>>
    %2 = vector.broadcast %1 : f32 to vector<256x128xf32>
    %3 = arith.mulf %0, %2 : vector<256x128xf32>
    %c0_2 = arith.constant 0 : index
    %4 = memref.load %arg2[%c0_2] : memref<3xf32, #tpu.memory_space<smem>>
    %5 = vector.broadcast %4 : f32 to vector<256x128xf32>
    %6 = arith.addf %3, %5 : vector<256x128xf32>
    %cst = arith.constant 0.000000e+00 : f32
    %7 = vector.broadcast %cst : f32 to vector<256x128xf32>
    %8 = arith.maximumf %6, %7 : vector<256x128xf32>
    %9 = math.absf %6 : vector<256x128xf32>
    %cst_3 = arith.constant 0.000000e+00 : f32
    %10 = vector.broadcast %cst_3 : f32 to vector<256x128xf32>
    %11 = arith.subf %10, %9 : vector<256x128xf32>
    %12 = math.exp %11 : vector<256x128xf32>
    %13 = math.log1p %12 : vector<256x128xf32>
    %14 = arith.addf %8, %13 : vector<256x128xf32>
    %c1 = arith.constant 1 : index
    %15 = memref.load %arg1[%c1] : memref<3xf32, #tpu.memory_space<smem>>
    %16 = vector.broadcast %15 : f32 to vector<256x128xf32>
    %17 = arith.mulf %14, %16 : vector<256x128xf32>
    %c1_4 = arith.constant 1 : index
    %18 = memref.load %arg2[%c1_4] : memref<3xf32, #tpu.memory_space<smem>>
    %19 = vector.broadcast %18 : f32 to vector<256x128xf32>
    %20 = arith.addf %17, %19 : vector<256x128xf32>
    %cst_5 = arith.constant 0.000000e+00 : f32
    %21 = vector.broadcast %cst_5 : f32 to vector<256x128xf32>
    %22 = arith.maximumf %20, %21 : vector<256x128xf32>
    %23 = math.absf %20 : vector<256x128xf32>
    %cst_6 = arith.constant 0.000000e+00 : f32
    %24 = vector.broadcast %cst_6 : f32 to vector<256x128xf32>
    %25 = arith.subf %24, %23 : vector<256x128xf32>
    %26 = math.exp %25 : vector<256x128xf32>
    %27 = math.log1p %26 : vector<256x128xf32>
    %28 = arith.addf %22, %27 : vector<256x128xf32>
    %c2 = arith.constant 2 : index
    %29 = memref.load %arg1[%c2] : memref<3xf32, #tpu.memory_space<smem>>
    %30 = vector.broadcast %29 : f32 to vector<256x128xf32>
    %31 = arith.mulf %28, %30 : vector<256x128xf32>
    %c2_7 = arith.constant 2 : index
    %32 = memref.load %arg2[%c2_7] : memref<3xf32, #tpu.memory_space<smem>>
    %33 = vector.broadcast %32 : f32 to vector<256x128xf32>
    %34 = arith.addf %31, %33 : vector<256x128xf32>
    %cst_8 = arith.constant 0.000000e+00 : f32
    %35 = vector.broadcast %cst_8 : f32 to vector<256x128xf32>
    %36 = arith.maximumf %34, %35 : vector<256x128xf32>
    %37 = math.absf %34 : vector<256x128xf32>
    %cst_9 = arith.constant 0.000000e+00 : f32
    %38 = vector.broadcast %cst_9 : f32 to vector<256x128xf32>
    %39 = arith.subf %38, %37 : vector<256x128xf32>
    %40 = math.exp %39 : vector<256x128xf32>
    %41 = math.log1p %40 : vector<256x128xf32>
    %42 = arith.addf %36, %41 : vector<256x128xf32>
    %c0_10 = arith.constant 0 : index
    %c0_11 = arith.constant 0 : index
    %43 = vector.load %arg4[%c0_10, %c0_11] : memref<256x128xf32, #tpu.memory_space<vmem>>, vector<256x128xf32>
    tpu.vector_store %arg4[%c0_10, %c0_11], %42 {strides = array<i32>} : memref<256x128xf32, #tpu.memory_space<vmem>>, vector<256x128xf32>,
    return
  }
  func.func @transform_0(%arg0: i32, %arg1: memref<3xf32, #tpu.memory_space<smem>>, %arg2: memref<3xf32, #tpu.memory_space<smem>>) -> (i32, i32) {
    %c0_i32 = arith.constant 0 : i32
    %c0_i32_0 = arith.constant 0 : i32
    return %arg0, %c0_i32 : i32, i32
  }
  func.func @transform_1(%arg0: i32, %arg1: memref<3xf32, #tpu.memory_space<smem>>, %arg2: memref<3xf32, #tpu.memory_space<smem>>) -> (i32, i32) {
    %c0_i32 = arith.constant 0 : i32
    %c0_i32_0 = arith.constant 0 : i32
    return %arg0, %c0_i32 : i32, i32
  }
}

</mosaic_0001>

<bundles_post_ra>
// kernel: func_model.1
= control target key start
LH: loop header
LB: loop body
LE: loop exit
PB: predicated region body
PF: predicated region fallthrough
CT: control target
= control target key end

     0   :  { %s4190_s0 = inlined_call_operand.vmem [shape: f32[3], index: 0, kind: input, shape index: {}]   ;;  %s4191_s2 = inlined_call_operand.hbm [shape: f32[512,128], index: 2, kind: input, shape index: {}]   ;;  %s4192_s3 = inlined_call_operand.hbm [shape: f32[512,128], index: 3, kind: output, shape index: {}]   ;;  %s4193_s1 = inlined_call_operand.vmem [shape: f32[3], index: 1, kind: input, shape index: {}]  }
   0x1   :  { %s8_s14 = sshll.u32 %s4190_s0, 4  ;;  %s12_s17 = sshll.u32 %s4193_s1, 4  ;;  %s9_s14 = int_to_ptr.vmem [resolvable:$true] %s8_s14  ;;  %s13_s17 = int_to_ptr.vmem [resolvable:$true] %s12_s17 }
   0x2   :  { %s2400_s18 = scalar_lea.vmem %s9_s14, 16  ;;  %p2405_p1 = scmp.lt.s32.totalorder %s9_s14, %s9_s14 }
   0x3   :  { %p2401_p0 = scmp.ne.s32.totalorder %s9_s14, %s2400_s18  ;;  %p2406_p2 = scmp.lt.s32.totalorder %s2400_s18, %s2400_s18 }
   0x5   :  { %p2407_p3 = por %p2406_p2, %p2405_p1 }
   0x7   :  { %p2408_p4 = pnand %p2407_p3, %p2401_p0 }
   0x9   :  { %2411 = shalt.err (!%p2408_p4)  }
   0xa   :  { %s2524_s19 = smov [#allocation3]   ;;  %s2412_s20 = scalar_lea.vmem %s13_s17, 16 }
   0xb   :  { %11 = dma.vmem_to_smem %s9_s14, 16, %s2524_s19, [#allocation2] }
   0xc   :  { %p2413_p5 = scmp.ne.s32.totalorder %s13_s17, %s2412_s20  ;;  %p2417_p6 = scmp.lt.s32.totalorder %s13_s17, %s13_s17 }
   0xd   :  { %p2418_p7 = scmp.lt.s32.totalorder %s2412_s20, %s2412_s20 }
   0xf   :  { %p2419_p8 = por %p2418_p7, %p2417_p6 }
  0x11   :  { %p2420_p9 = pnand %p2419_p8, %p2413_p5 }
  0x13   :  { %2423 = shalt.err (!%p2420_p9)  }
  0x14   :  { %s2525_s0 = smov [#allocation4]  }
  0x15   :  { %15 = dma.vmem_to_smem %s13_s17, 16, %s2525_s0, [#allocation2] }
  0x16   :  { %2498 = dma.done.wait [#allocation2], 32 }
  0x17   :  { %2499 = vsyncadd [#allocation2], 4294967264 }
  0x18   :  { %17 = sfence }
  0x19   :  { %18 = vsyncpa [#allocation6], 0 }
  0x1a   :  { %20 = vsyncpa [#allocation6 + $0x1], 0 }
  0x1b   :  { %21 = vsyncpa [#allocation7], 0 }
  0x1c   :  { %23 = vsyncpa [#allocation7 + $0x1], 0  ;;  %s2558_s1 = smov 0   ;;  %s2560_s21 = smov 0  }
  0x1d   :  { %s2562_s22 = smov 0   ;;  %s2564_s23 = smov 0  }
  0x1e LB: > { %s2579_s24 = sadd.s32 4294967295, %s2522_s23   ;;  %s1944_s25 = sadd.s32 4294967294, %s2522_s23   ;;  %s2522_s23 = sphi %s2564_s23, %s4376_s23   ;;  %s2518_s22 = sphi %s2562_s22, %s4375_s22   ;;  %s2514_s21 = sphi %s2560_s21, %s4374_s21   ;;  %s2510_s1 = sphi %s2558_s1, %s4373_s1  }
  0x1f   : > { %s2583_s26 = sadd.s32 1, %s2522_s23   ;;  %s36_s27 = sadd.s32 1, %s2518_s22 }
  0x20   : > { %s33_s28 = ssub.s32 %s2522_s23, %s2583_s26  ;;  %p43_p10 = scmp.ne.s32.totalorder %s2518_s22, %s2514_s21 }
  0x21   : > { %p34_p11 = scmp.eq.s32.totalorder %s33_s28, 0  ;;  %p44_p12 = scmp.eq.s32.totalorder %s2522_s23, 0 }
  0x22   : > { %p49_p13 = scmp.ne.s32.totalorder %s2514_s21, %s2510_s1  ;;  %p50_p0 = scmp.eq.s32.totalorder %s2579_s24, 0 }
  0x23   : > { %s2595_s29 = scalar_select %p34_p11, %s2518_s22, %s36_s27  }
  0x24   : > { %p2597_p1 = por %p44_p12, %p43_p10  ;;  %p2601_p2 = por %p50_p0, %p49_p13 }
  0x25   : > { %p73_p3 = scmp.eq.s32.totalorder %s2579_s24, 1  ;;  %p79_p4 = scmp.eq.s32.totalorder %s1944_s25, 1 }
  0x26   : > { %p1976_p6 = scmp.lt.s32.totalorder %s2522_s23, 2  ;;  %s99_s7 = sand.u32 1, %s2518_s22  }
  0x27   : > { %p2608_p7 = por %p73_p3, %p43_p10  ;;  %p2612_p8 = por %p79_p4, %p49_p13 }
  0x28   : > { %s1962_s8 = sshll.u32 %s2522_s23, 12  ;;  %s1947_s9 = sshll.u32 %s99_s7, 8 }
  0x29   : > { %s4197_s5 = scalar_select %p2608_p7, 1, 0 }
  0x2a   : > { %s4198_s6 = scalar_select %p2612_p8, 1, 0 }
  0x2b   : > { %s2621_s12 = scalar_lea.hbm %s4191_s2, %s1962_s8  ;;  %s103_s13 = scalar_lea.vmem [#allocation5], %s1947_s9 }
  0x2c   : > { %s110_s14 = sshll.u32 %s103_s13, 4  ;;  %p2625_p9 = pnand %p1976_p6, %p2597_p1  ;;  %s2629_s14 = int_to_ptr.vmem [resolvable:$true] %s110_s14 }
  0x2d   : > { %s2631_s16 = scalar_lea.sflag [#allocation6], %s99_s7  ;;  %s2424_s17 = scalar_lea.hbm %s2621_s12, 4096 }
  0x2e   : > { %p2425_p10 = scmp.ne.s32.totalorder %s2621_s12, %s2424_s17  ;;  %p2426_p11 = pneg %p2625_p9 }
  0x2f   : > { %s2429_s20 = scalar_lea.hbm %s4191_s2, 8192  ;;  %p2430_p0 = scmp.lt.u32.totalorder %s2621_s12, %s4191_s2 }
  0x30   : > { %p2427_p12 = pnand %p2426_p11, %p2425_p10  ;;  %p2431_p1 = scmp.lt.u32.totalorder %s2429_s20, %s2424_s17 }
  0x31   : > { %p2433_p4 = scmp.lt.u32.totalorder %s2424_s17, %s2621_s12 }
  0x32   : > { %p2428_p13 = pneg %p2427_p12  ;;  %p2432_p3 = por %p2431_p1, %p2430_p0 }
  0x34   : > { %p2434_p6 = por %p2433_p4, %p2432_p3 }
  0x36   : > { %p2435_p5 = pnand %p2434_p6, %p2428_p13 }
  0x38   : > { %2438 = shalt.err (!%p2435_p5)
}
  0x39   : > { %s2439_s27 = scalar_lea.vmem %s2629_s14, 4096  ;;  %s2526_s28 = smov [#allocation5]  }
  0x3a   : > { %p2440_p10 = scmp.ne.s32.totalorder %s2629_s14, %s2439_s27  ;;  %s2444_s30 = sshll.u32 %s2526_s28, 4  ;;  %s2445_s30 = int_to_ptr.vmem [resolvable:$false] %s2444_s30 }
  0x3b   : > { %s2446_s7 = scalar_lea.vmem %s2445_s30, 8192  ;;  %p2447_p7 = scmp.lt.s32.totalorder %s2629_s14, %s2445_s30 }
  0x3c   : > { %p2442_p12 = pnand %p2440_p10, %p2426_p11  ;;  %p2448_p0 = scmp.lt.s32.totalorder %s2446_s7, %s2439_s27 }
  0x3e   : > { %p2443_p8 = pneg %p2442_p12  ;;  %p2449_p1 = por %p2448_p0, %p2447_p7 }
  0x40   : > { %p2450_p3 = pnand %p2449_p1, %p2443_p8 }
  0x42   : > { %2453 = shalt.err (!%p2450_p3)
}
  0x43   : > { %s2527_s8 = smov 128   ;;  %s2528_s9 = smov 8  }
  0x44   : > { %1971 = dma.hbm_to_vmem [thread:$0]  (!%p2625_p9), %s2621_s12, 4096, %s2629_s14, %s2631_s16, %s2527_s8, %s2527_s8, %s2528_s9  }
  0x45   : > { %p1950_p5 = scmp.ge.s32.totalorder %s2522_s23, 1  ;;  %p118_p11 = scmp.lt.s32.totalorder %s2522_s23, 3 }
  0x47   : > { %p119_p13 = pnand %p1950_p5, %p118_p11 }
  0x48   : > { %s2662_s10 = sand.u32 (!%p119_p13), 1, %s2514_s21  }
  0x49   : > { %122 = sbr.rel (%p119_p13) target bundleno = 566 (0x236), region = 24  ;;  %s1951_s11 = sshll.u32 (!%p119_p13), %s2662_s10, 8 }
  0x4a   : > { %s125_s13 = scalar_lea.sflag (!%p119_p13), [#allocation6], %s2662_s10  ;;  %s2668_s17 = scalar_lea.vmem (!%p119_p13), [#allocation5], %s1951_s11 }
  0x50   : > { %2501 = dma.done.wait (%p2601_p2), %s125_s13, 4096  }
  0x51   : > { %2503 = vsyncadd (%p2601_p2), %s125_s13, 4294963200  ;;  %s181_s12 = sld [smem:[#allocation3]]  ;;  %v149_v0 = vld [vmem:[%s2668_s17] sm:$0xff]  ;;  %v150_v3 = vld [vmem:[%s2668_s17 + $0x8] sm:$0xff]  ;;  %s2681_s4 = sld [smem:[#allocation3 + $0x1]] }
  0x52   : > { %s215_s14 = sld [smem:[#allocation4]]  ;;  %v151_v6 = vld [vmem:[%s2668_s17 + $0x10] sm:$0xff]  ;;  %v152_v7 = vld [vmem:[%s2668_s17 + $0x18] sm:$0xff]  ;;  %v153_v10 = vld [vmem:[%s2668_s17 + $0x20] sm:$0xff]  ;;  %s2693_s15 = sld [smem:[#allocation4 + $0x1]] }
  0x53   : > { %v154_v11 = vld [vmem:[%s2668_s17 + $0x28] sm:$0xff]  ;;  %v155_v16 = vld [vmem:[%s2668_s17 + $0x30] sm:$0xff]  ;;  %v156_v17 = vld [vmem:[%s2668_s17 + $0x38] sm:$0xff]  ;;  %s2702_s16 = sld [smem:[#allocation3 + $0x2]]  ;;  %s3139_s19 = scalar_lea.vmem [#allocation8], %s1951_s11 }
  0x54   : > { %s2716_s18 = sld [smem:[#allocation4 + $0x2]]  ;;  %v157_v30 = vld [vmem:[%s2668_s17 + $0x40] sm:$0xff]  ;;  %v158_v45 = vld [vmem:[%s2668_s17 + $0x48] sm:$0xff]  ;;  %v159_v49 = vld [vmem:[%s2668_s17 + $0x50] sm:$0xff]  ;;  %s1963_s20 = sshll.u32 %s2579_s24, 12 }
  0x55   : > { %v160_v60 = vld [vmem:[%s2668_s17 + $0x58] sm:$0xff]  ;;  %s1871_s0 = sshll.u32 %s3139_s19, 4  ;;  %s4143_s28 = scalar_lea.hbm %s4192_s3, %s1963_s20  ;;  %s4145_s0 = int_to_ptr.vmem [resolvable:$true] %s1871_s0 }
  0x56   : > { %s1858_s30 = scalar_lea.sflag [#allocation7], %s2662_s10  ;;  %s2454_s7 = scalar_lea.vmem %s4145_s0, 4096 }
  0x57   : > { %v2675_v1 = vstv %s181_s12  ;;  %v2732_v36 = vstv %s2681_s4  ;;  %p2455_p2 = scmp.ne.s32.totalorder %s4145_s0, %s2454_s7  ;;  %p4370_p7 = scmp.ne.s32.totalorder %s4197_s5, 0 }
  0x58   : > { %v2677_v2 = vstv %s215_s14  ;;  %v183_v4 = vmul.f32 %v2675_v1, %v149_v0  ;;  %v184_v5 = vmul.f32 %v2675_v1, %v150_v3  ;;  %v185_v8 = vmul.f32 %v2675_v1, %v151_v6  ;;  %s2529_s24 = smov [#allocation8]  }
  0x59   : > { %v186_v9 = vmul.f32 %v2675_v1, %v152_v7  ;;  %v187_v14 = vmul.f32 %v2675_v1, %v153_v10  ;;  %v188_v15 = vmul.f32 %v2675_v1, %v154_v11  ;;  %v189_v20 = vmul.f32 %v2675_v1, %v155_v16  ;;  %p2456_p8 = pnand %p2455_p2, %p4370_p7  ;;  %s2458_s8 = sshll.u32 %s2529_s24, 4  ;;  %s2459_s8 = int_to_ptr.vmem [resolvable:$false] %s2458_s8 }
  0x5a   : > { %v2691_v12 = vadd.f32 %v2677_v2, %v183_v4  ;;  %v2696_v13 = vadd.f32 %v2677_v2, %v184_v5  ;;  %v2705_v18 = vadd.f32 %v2677_v2, %v185_v8  ;;  %v190_v21 = vmul.f32 %v2675_v1, %v156_v17  ;;  %v161_v8 = vld [vmem:[%s2668_s17 + $0x60] sm:$0xff]  ;;  %s2460_s9 = scalar_lea.vmem %s2459_s8, 8192  ;;  %p2461_p4 = scmp.lt.s32.totalorder %s4145_s0, %s2459_s8 }
  0x5b   : > { %v2708_v19 = vadd.f32 %v2677_v2, %v186_v9  ;;  %v2719_v28 = vadd.f32 %v2677_v2, %v187_v14  ;;  %v2722_v29 = vadd.f32 %v2677_v2, %v188_v15  ;;  %v2726_v33 = vadd.f32 %v2677_v2, %v189_v20  ;;  %p2457_p9 = pneg %p2456_p8  ;;  %p2462_p6 = scmp.lt.s32.totalorder %s2460_s9, %s2454_s7 }
  0x5c   : > { %v281_v22 = vand.u32 2147483647, %v2691_v12  ;;  %v282_v23 = vand.u32 2147483647, %v2696_v13  ;;  %v283_v24 = vand.u32 2147483647, %v2705_v18  ;;  %v2729_v34 = vadd.f32 %v2677_v2, %v190_v21 }
  0x5d   : > { %v284_v25 = vand.u32 2147483647, %v2708_v19  ;;  %v285_v40 = vand.u32 2147483647, %v2719_v28  ;;  %v191_v41 = vmul.f32 %v2675_v1, %v157_v30  ;;  %v2737_v42 = vstv %s2693_s15  ;;  %p2463_p10 = por %p2462_p6, %p2461_p4 }
  0x5e   : > { %v313_v26 = vsub.f32 0.0, %v281_v22  ;;  %v314_v27 = vsub.f32 0.0, %v282_v23  ;;  %v315_v31 = vsub.f32 0.0, %v283_v24  ;;  %v286_v43 = vand.u32 2147483647, %v2722_v29 }
  0x5f   : > { %v316_v32 = vsub.f32 0.0, %v284_v25  ;;  %v287_v44 = vand.u32 2147483647, %v2726_v33  ;;  %v2743_v46 = vstv %s2702_s16  ;;  %v317_v47 = vsub.f32 0.0, %v285_v40  ;;  %p2464_p12 = pnand %p2463_p10, %p2457_p9 }
  0x60   : > { %v345_v35 = vmul.f32 1.442695, %v313_v26  ;;  %v347_v37 = vmul.f32 1.442695, %v314_v27  ;;  %v349_v38 = vmul.f32 1.442695, %v315_v31  ;;  %v2748_v52 = vadd.f32 %v2677_v2, %v191_v41 }
  0x61   : > { %v351_v39 = vmul.f32 1.442695, %v316_v32  ;;  %v288_v48 = vand.u32 2147483647, %v2729_v34  ;;  %v318_v50 = vsub.f32 0.0, %v286_v43  ;;  %v319_v51 = vsub.f32 0.0, %v287_v44 }
  0x62   : > { %2016 = vpow2.f32 %v345_v35  ;;  %v353_v53 = vmul.f32 1.442695, %v317_v47  ;;  %v192_v55 = vmul.f32 %v2675_v1, %v158_v45  ;;  %v2752_v56 = vstv %s2716_s18  ;;  %v162_v32 = vld [vmem:[%s2668_s17 + $0x68] sm:$0xff] }
  0x63   : > { %2018 = vpow2.f32 %v347_v37  ;;  %v320_v54 = vsub.f32 0.0, %v288_v48  ;;  %v355_v57 = vmul.f32 1.442695, %v318_v50  ;;  %v357_v58 = vmul.f32 1.442695, %v319_v51 }
  0x64   : > { %2020 = vpow2.f32 %v349_v38  ;;  %v193_v59 = vmul.f32 %v2675_v1, %v159_v49  ;;  %v249_v61 = vmax.f32 %v2691_v12, 0.0  ;;  %v289_v62 = vand.u32 2147483647, %v2748_v52 }
  0x65   : > { %2022 = vpow2.f32 %v351_v39  ;;  %v2759_v63 = vadd.f32 %v2677_v2, %v192_v55  ;;  %v250_v0 = vmax.f32 %v2696_v13, 0.0  ;;  %v251_v3 = vmax.f32 %v2705_v18, 0.0 }
  0x66   : > { %2024 = vpow2.f32 %v353_v53  ;;  %v359_v4 = vmul.f32 1.442695, %v320_v54  ;;  %v321_v5 = vsub.f32 0.0, %v289_v62  ;;  %v194_v7 = vmul.f32 %v2675_v1, %v160_v60 }
  0x67   : > { %2026 = vpow2.f32 %v355_v57  ;;  %v290_v6 = vand.u32 2147483647, %v2759_v63  ;;  %v252_v9 = vmax.f32 %v2708_v19, 0.0  ;;  %v253_v10 = vmax.f32 %v2719_v28, 0.0 }
  0x68   : > { %2028 = vpow2.f32 %v357_v58  ;;  %v254_v11 = vmax.f32 %v2722_v29, 0.0  ;;  %v2770_v14 = vadd.f32 %v2677_v2, %v193_v59  ;;  %v255_v15 = vmax.f32 %v2726_v33, 0.0 }
  0x69   : > { %v256_v16 = vmax.f32 %v2729_v34, 0.0  ;;  %v257_v17 = vmax.f32 %v2748_v52, 0.0  ;;  %v361_v20 = vmul.f32 1.442695, %v321_v5  ;;  %2030 = vpow2.f32 %v359_v4 }
  0x6a   : > { %v195_v24 = vmul.f32 %v2675_v1, %v161_v8  ;;  %v322_v30 = vsub.f32 0.0, %v290_v6  ;;  %v2779_v31 = vadd.f32 %v2677_v2, %v194_v7  ;;  %v291_v44 = vand.u32 2147483647, %v2770_v14 }
  0x6b   : > { %2032 = vpow2.f32 %v361_v20  ;;  %v2787_v48 = vmul.f32 %v2675_v1, %v162_v32 }
  0x6c   : > { %v2017_v21 = vpop.eup %2016  ;;  %v2784_v47 = vadd.f32 %v2677_v2, %v195_v24  ;;  %v2789_v51 = vmul.f32 1.442695, %v322_v30  ;;  %v2800_v20 = vsub.f32 0.0, %v291_v44 }
  0x6d   : > { %v2019_v25 = vpop.eup %2018  ;;  %v409_v26 = vadd.f32 1.0, %v2017_v21  ;;  %v412_v27 = vmul.f32 -0.5, %v2017_v21  ;;  %v415_v37 = vand.u32 2147483647, %v2017_v21 }
  0x6e   : > { %v2021_v35 = vpop.eup %2020  ;;  %v418_v38 = vadd.f32 1.0, %v2019_v25  ;;  %v421_v39 = vmul.f32 -0.5, %v2019_v25  ;;  %v424_v41 = vand.u32 2147483647, %v2019_v25 }
  0x6f   : > { %v2023_v40 = vpop.eup %2022  ;;  %2034 = vlog2.f32 %v409_v26  ;;  %v427_v43 = vadd.f32 1.0, %v2021_v35  ;;  %v430_v45 = vmul.f32 -0.5, %v2021_v35  ;;  %v413_v55 = vadd.f32 1.0, %v412_v27 }
  0x70   : > { %2036 = vlog2.f32 %v418_v38  ;;  %v2025_v49 = vpop.eup %2024  ;;  %v436_v50 = vadd.f32 1.0, %v2023_v40  ;;  %vm2792_vm0 = vcmp.lt.f32.partialorder %v415_v37, 0.0004427343  ;;  %v422_v58 = vadd.f32 1.0, %v421_v39 }
  0x71   : > { %2038 = vlog2.f32 %v427_v43  ;;  %v2027_v54 = vpop.eup %2026  ;;  %v439_v59 = vmul.f32 -0.5, %v2023_v40  ;;  %vm2796_vm1 = vcmp.lt.f32.partialorder %v424_v41, 0.0004427343  ;;  %v445_v4 = vadd.f32 1.0, %v2025_v49 }
  0x72   : > { %v2029_v60 = vpop.eup %2028  ;;  %2040 = vlog2.f32 %v436_v50  ;;  %v448_v5 = vmul.f32 -0.5, %v2025_v49  ;;  %v431_v6 = vadd.f32 1.0, %v430_v45  ;;  %v433_v7 = vand.u32 2147483647, %v2021_v35 }
  0x73   : > { %v442_v8 = vand.u32 2147483647, %v2023_v40  ;;  %v440_v24 = vadd.f32 1.0, %v439_v59  ;;  %2042 = vlog2.f32 %v445_v4  ;;  %v454_v26 = vadd.f32 1.0, %v2027_v54  ;;  %v2802_v30 = vpop.eup %2030 }
  0x74   : > { %v457_v27 = vmul.f32 -0.5, %v2027_v54  ;;  %v414_v32 = vmul.f32 %v2017_v21, %v413_v55  ;;  %v449_v37 = vadd.f32 1.0, %v448_v5  ;;  %v451_v38 = vand.u32 2147483647, %v2025_v49 }
  0x75   : > { %v463_v39 = vadd.f32 1.0, %v2029_v60  ;;  %v423_v41 = vmul.f32 %v2019_v25, %v422_v58  ;;  %2044 = vlog2.f32 %v454_v26  ;;  %v460_v43 = vand.u32 2147483647, %v2027_v54  ;;  %v2804_v23 = vpop.eup %2032 }
  0x76   : > { %v466_v50 = vmul.f32 -0.5, %v2029_v60  ;;  %v432_v45 = vmul.f32 %v2021_v35, %v431_v6  ;;  %vm2806_vm2 = vcmp.lt.f32.partialorder %v433_v7, 0.0004427343  ;;  %vm2810_vm3 = vcmp.lt.f32.partialorder %v442_v8, 0.0004427343 }
  0x77   : > { %v458_v4 = vadd.f32 1.0, %v457_v27  ;;  %v441_v55 = vmul.f32 %v2023_v40, %v440_v24  ;;  %2046 = vlog2.f32 %v463_v39  ;;  %v469_v5 = vand.u32 2147483647, %v2029_v60 }
  0x78   : > { %v472_v25 = vadd.f32 1.0, %v2802_v30  ;;  %v450_v22 = vmul.f32 %v2025_v49, %v449_v37  ;;  %vm2815_vm4 = vcmp.lt.f32.partialorder %v451_v38, 0.0004427343  ;;  %v467_v6 = vadd.f32 1.0, %v466_v50 }
  0x79   : > { %v2035_v21 = vpop.eup %2034  ;;  %vm2819_vm5 = vcmp.lt.f32.partialorder %v460_v43, 0.0004427343  ;;  %v475_v40 = vmul.f32 -0.5, %v2802_v30  ;;  %v481_v24 = vadd.f32 1.0, %v2804_v23  ;;  %v459_v49 = vmul.f32 %v2027_v54, %v458_v4 }
  0x7a   : > { %v2037_v58 = vpop.eup %2036  ;;  %v411_v26 = vmul.f32 0.6931472, %v2035_v21  ;;  %v478_v37 = vand.u32 2147483647, %v2802_v30  ;;  %vm2832_vm6 = vcmp.lt.f32.partialorder %v469_v5, 0.0004427343  ;;  %2048 = vlog2.f32 %v472_v25 }
  0x7b   : > { %v2039_v7 = vpop.eup %2038  ;;  %v420_v8 = vmul.f32 0.6931472, %v2037_v58  ;;  %v468_v4 = vmul.f32 %v2029_v60, %v467_v6  ;;  %v476_v62 = vadd.f32 1.0, %v475_v40  ;;  %2050 = vlog2.f32 %v481_v24 }
  0x7c   : > { %v417_v27 = vsel %vm2792_vm0, %v414_v32, %v411_v26  ;;  %v429_v39 = vmul.f32 0.6931472, %v2039_v7  ;;  %v2041_v38 = vpop.eup %2040  ;;  %2052 = vpow2.f32 %v2789_v51  ;;  %vm2865_vm7 = vcmp.lt.f32.partialorder %v478_v37, 0.0004427343 }
  0x7d   : > { %v697_v50 = vadd.f32 %v417_v27, %v249_v61  ;;  %v426_v43 = vsel %vm2796_vm1, %v423_v41, %v420_v8  ;;  %v438_v32 = vmul.f32 0.6931472, %v2041_v38  ;;  %v2043_v58 = vpop.eup %2042 }
  0x7e   : > { %v698_v57 = vadd.f32 %v426_v43, %v250_v0  ;;  %v435_v54 = vsel %vm2806_vm2, %v432_v45, %v429_v39  ;;  %v447_v13 = vmul.f32 0.6931472, %v2043_v58  ;;  %v484_v0 = vmul.f32 -0.5, %v2804_v23 }
  0x7f   : > { %v731_v12 = vmul.f32 %v2732_v36, %v697_v50  ;;  %v699_v61 = vadd.f32 %v435_v54, %v251_v3  ;;  %v444_v5 = vsel %vm2810_vm3, %v441_v55, %v438_v32  ;;  %v2045_v44 = vpop.eup %2044  ;;  %v487_v3 = vand.u32 2147483647, %v2804_v23 }
  0x80   : > { %v732_v41 = vmul.f32 %v2732_v36, %v698_v57  ;;  %v700_v18 = vadd.f32 %v444_v5, %v252_v9  ;;  %v453_v59 = vsel %vm2815_vm4, %v450_v22, %v447_v13  ;;  %v456_v55 = vmul.f32 0.6931472, %v2045_v44  ;;  %v163_v5 = vld [vmem:[%s2668_s17 + $0x70] sm:$0xff] }
  0x81   : > { %v2848_v45 = vadd.f32 %v2737_v42, %v731_v12  ;;  %v733_v60 = vmul.f32 %v2732_v36, %v699_v61  ;;  %v2047_v26 = vpop.eup %2046  ;;  %v701_v22 = vadd.f32 %v453_v59, %v253_v10  ;;  %v485_v35 = vadd.f32 1.0, %v484_v0 }
  0x82   : > { %v2855_v25 = vadd.f32 %v2737_v42, %v732_v41  ;;  %v734_v19 = vmul.f32 %v2732_v36, %v700_v18  ;;  %v462_v51 = vsel %vm2819_vm5, %v459_v49, %v456_v55  ;;  %vm2878_vm8 = vcmp.lt.f32.partialorder %v487_v3, 0.0004427343 }
  0x83   : > { %v829_v6 = vand.u32 2147483647, %v2848_v45  ;;  %v2862_v7 = vadd.f32 %v2737_v42, %v733_v60  ;;  %v735_v38 = vmul.f32 %v2732_v36, %v701_v22  ;;  %v702_v28 = vadd.f32 %v462_v51, %v254_v11 }
  0x84   : > { %v830_v8 = vand.u32 2147483647, %v2855_v25  ;;  %v2876_v27 = vadd.f32 %v2737_v42, %v734_v19  ;;  %v465_v10 = vmul.f32 0.6931472, %v2047_v26  ;;  %v2049_v53 = vpop.eup %2048  ;;  %v477_v57 = vmul.f32 %v2802_v30, %v476_v62 }
  0x85   : > { %v861_v40 = vsub.f32 0.0, %v829_v6  ;;  %v831_v24 = vand.u32 2147483647, %v2862_v7  ;;  %v2888_v32 = vadd.f32 %v2737_v42, %v735_v38  ;;  %v736_v58 = vmul.f32 %v2732_v36, %v702_v28  ;;  %v2051_v29 = vpop.eup %2050 }
  0x86   : > { %v862_v37 = vsub.f32 0.0, %v830_v8  ;;  %v832_v43 = vand.u32 2147483647, %v2876_v27  ;;  %v471_v12 = vsel %vm2832_vm6, %v468_v4, %v465_v10  ;;  %v486_v13 = vmul.f32 %v2804_v23, %v485_v35  ;;  %v2902_v44 = vpop.eup %2052 }
  0x87   : > { %v893_v49 = vmul.f32 1.442695, %v861_v40  ;;  %v863_v50 = vsub.f32 0.0, %v831_v24  ;;  %v703_v41 = vadd.f32 %v471_v12, %v255_v15  ;;  %v833_v30 = vand.u32 2147483647, %v2888_v32 }
  0x88   : > { %v895_v54 = vmul.f32 1.442695, %v862_v37  ;;  %v864_v61 = vsub.f32 0.0, %v832_v43  ;;  %v2898_v62 = vadd.f32 %v2737_v42, %v736_v58  ;;  %v474_v4 = vmul.f32 0.6931472, %v2049_v53 }
  0x89   : > { %2054 = vpow2.f32 %v893_v49  ;;  %v897_v11 = vmul.f32 1.442695, %v863_v50  ;;  %v737_v21 = vmul.f32 %v2732_v36, %v703_v41  ;;  %v865_v60 = vsub.f32 0.0, %v833_v30 }
  0x8a   : > { %2056 = vpow2.f32 %v895_v54  ;;  %v899_v0 = vmul.f32 1.442695, %v864_v61  ;;  %v834_v33 = vand.u32 2147483647, %v2898_v62  ;;  %v483_v15 = vmul.f32 0.6931472, %v2051_v29 }
  0x8b   : > { %2058 = vpow2.f32 %v897_v11  ;;  %v2906_v18 = vmul.f32 %v2675_v1, %v163_v5  ;;  %v2909_v3 = vadd.f32 %v2737_v42, %v737_v21  ;;  %v480_v23 = vsel %vm2865_vm7, %v477_v57, %v474_v4 }
  0x8c   : > { %2060 = vpow2.f32 %v899_v0  ;;  %v365_v59 = vmul.f32 1.442695, %v2800_v20  ;;  %v901_v55 = vmul.f32 1.442695, %v865_v60  ;;  %v866_v26 = vsub.f32 0.0, %v834_v33 }
  0x8d   : > { %v704_v6 = vadd.f32 %v480_v23, %v256_v16  ;;  %v489_v19 = vsel %vm2878_vm8, %v486_v13, %v483_v15  ;;  %v835_v8 = vand.u32 2147483647, %v2909_v3  ;;  %v490_v51 = vadd.f32 1.0, %v2902_v44 }
  0x8e   : > { %v705_v22 = vadd.f32 %v489_v19, %v257_v17  ;;  %v4218_v9 = vand.u32 2147483647, %v2779_v31  ;;  %v797_v20 = vmax.f32 %v2848_v45, 0.0  ;;  %v798_v40 = vmax.f32 %v2855_v25, 0.0 }
  0x8f   : > { %2062 = vpow2.f32 %v901_v55  ;;  %v903_v34 = vmul.f32 1.442695, %v866_v26  ;;  %v799_v16 = vmax.f32 %v2862_v7, 0.0  ;;  %v800_v24 = vmax.f32 %v2876_v27, 0.0 }
  0x90   : > { %v324_v35 = vsub.f32 0.0, %v4218_v9  ;;  %v867_v37 = vsub.f32 0.0, %v835_v8  ;;  %v738_v38 = vmul.f32 %v2732_v36, %v704_v6  ;;  %v739_v53 = vmul.f32 %v2732_v36, %v705_v22 }
  0x91   : > { %2064 = vpow2.f32 %v903_v34  ;;  %v493_v49 = vmul.f32 -0.5, %v2902_v44  ;;  %v496_v54 = vand.u32 2147483647, %v2902_v44 }
  0x92   : > { %v905_v10 = vmul.f32 1.442695, %v867_v37  ;;  %2066 = vlog2.f32 %v490_v51  ;;  %v2936_v5 = vadd.f32 %v2737_v42, %v738_v38  ;;  %v2938_v21 = vmul.f32 1.442695, %v324_v35 }
  0x93   : > { %v2055_v28 = vpop.eup %2054  ;;  %2068 = vpow2.f32 %v365_v59  ;;  %v494_v0 = vadd.f32 1.0, %v493_v49  ;;  %v2942_v33 = vadd.f32 %v2737_v42, %v739_v53  ;;  %vm2953_vm11 = vcmp.lt.f32.partialorder %v496_v54, 0.0004427343 }
  0x94   : > { %v2057_v50 = vpop.eup %2056  ;;  %v957_v43 = vadd.f32 1.0, %v2055_v28  ;;  %v960_v57 = vmul.f32 -0.5, %v2055_v28  ;;  %v963_v12 = vand.u32 2147483647, %v2055_v28  ;;  %2070 = vpow2.f32 %v905_v10 }
  0x95   : > { %v2059_v58 = vpop.eup %2058  ;;  %v966_v29 = vadd.f32 1.0, %v2057_v50  ;;  %v969_v11 = vmul.f32 -0.5, %v2057_v50  ;;  %v972_v61 = vand.u32 2147483647, %v2057_v50  ;;  %v836_v8 = vand.u32 2147483647, %v2936_v5 }
  0x96   : > { %2072 = vlog2.f32 %v957_v43  ;;  %v975_v41 = vadd.f32 1.0, %v2059_v58  ;;  %v2061_v30 = vpop.eup %2060  ;;  %v978_v13 = vmul.f32 -0.5, %v2059_v58  ;;  %v961_v15 = vadd.f32 1.0, %v960_v57 }
  0x97   : > { %2074 = vlog2.f32 %v966_v29  ;;  %v984_v4 = vadd.f32 1.0, %v2061_v30  ;;  %vm2944_vm9 = vcmp.lt.f32.partialorder %v963_v12, 0.0004427343  ;;  %v970_v59 = vadd.f32 1.0, %v969_v11 }
  0x98   : > { %2076 = vlog2.f32 %v975_v41  ;;  %v987_v55 = vmul.f32 -0.5, %v2061_v30  ;;  %vm2948_vm10 = vcmp.lt.f32.partialorder %v972_v61, 0.0004427343  ;;  %v981_v19 = vand.u32 2147483647, %v2059_v58 }
  0x99   : > { %v2063_v26 = vpop.eup %2062  ;;  %2078 = vlog2.f32 %v984_v4  ;;  %v979_v22 = vadd.f32 1.0, %v978_v13  ;;  %v990_v9 = vand.u32 2147483647, %v2061_v30  ;;  %v868_v53 = vsub.f32 0.0, %v836_v8 }
  0x9a   : > { %v988_v51 = vadd.f32 1.0, %v987_v55  ;;  %v993_v35 = vadd.f32 1.0, %v2063_v26  ;;  %v996_v38 = vmul.f32 -0.5, %v2063_v26  ;;  %v999_v10 = vand.u32 2147483647, %v2063_v26 }
  0x9b   : > { %v2065_v37 = vpop.eup %2064  ;;  %v837_v49 = vand.u32 2147483647, %v2942_v33  ;;  %v962_v57 = vmul.f32 %v2055_v28, %v961_v15  ;;  %v971_v61 = vmul.f32 %v2057_v50, %v970_v59  ;;  %vm2960_vm12 = vcmp.lt.f32.partialorder %v981_v19, 0.0004427343 }
  0x9c   : > { %v2067_v43 = vpop.eup %2066  ;;  %2080 = vlog2.f32 %v993_v35  ;;  %v1002_v12 = vadd.f32 1.0, %v2065_v37  ;;  %v1005_v29 = vmul.f32 -0.5, %v2065_v37  ;;  %v997_v54 = vadd.f32 1.0, %v996_v38 }
  0x9d   : > { %v2958_v11 = vpop.eup %2068  ;;  %v980_v55 = vmul.f32 %v2059_v58, %v979_v22  ;;  %vm2965_vm13 = vcmp.lt.f32.partialorder %v990_v9, 0.0004427343  ;;  %v869_v28 = vsub.f32 0.0, %v837_v49  ;;  %v989_v35 = vmul.f32 %v2061_v30, %v988_v51 }
  0x9e   : > { %v2071_v4 = vpop.eup %2070  ;;  %2082 = vlog2.f32 %v1002_v12  ;;  %vm2969_vm14 = vcmp.lt.f32.partialorder %v999_v10, 0.0004427343  ;;  %v907_v59 = vmul.f32 1.442695, %v868_v53  ;;  %v1006_v17 = vadd.f32 1.0, %v1005_v29 }
  0x9f   : > { %v1011_v50 = vadd.f32 1.0, %v2071_v4  ;;  %v1008_v13 = vand.u32 2147483647, %v2065_v37  ;;  %v1014_v52 = vmul.f32 -0.5, %v2071_v4  ;;  %v998_v9 = vmul.f32 %v2063_v26, %v997_v54 }
  0xa0   : > { %v2073_v15 = vpop.eup %2072  ;;  %v492_v39 = vmul.f32 0.6931472, %v2067_v43  ;;  %v909_v51 = vmul.f32 1.442695, %v869_v28  ;;  %v495_v10 = vmul.f32 %v2902_v44, %v494_v0  ;;  %v1007_v6 = vmul.f32 %v2065_v37, %v1006_v17 }
  0xa1   : > { %v2075_v19 = vpop.eup %2074  ;;  %v959_v38 = vmul.f32 0.6931472, %v2073_v15  ;;  %2084 = vlog2.f32 %v1011_v50  ;;  %v1017_v15 = vand.u32 2147483647, %v2071_v4  ;;  %vm2987_vm15 = vcmp.lt.f32.partialorder %v1008_v13, 0.0004427343 }
  0xa2   : > { %v2077_v58 = vpop.eup %2076  ;;  %v968_v22 = vmul.f32 0.6931472, %v2075_v19  ;;  %2086 = vpow2.f32 %v907_v59  ;;  %v4235_v17 = vmax.f32 %v2759_v63, 0.0  ;;  %v502_v50 = vmul.f32 -0.5, %v2958_v11 }
  0xa3   : > { %v965_v49 = vsel %vm2944_vm9, %v962_v57, %v959_v38  ;;  %v977_v30 = vmul.f32 0.6931472, %v2077_v58  ;;  %v2079_v12 = vpop.eup %2078  ;;  %v1015_v57 = vadd.f32 1.0, %v1014_v52  ;;  %2088 = vpow2.f32 %v909_v51 }
  0xa4   : > { %v1245_v53 = vadd.f32 %v965_v49, %v797_v20  ;;  %v974_v29 = vsel %vm2948_vm10, %v971_v61, %v968_v22  ;;  %v986_v43 = vmul.f32 0.6931472, %v2079_v12  ;;  %v498_v20 = vsel %vm2953_vm11, %v495_v10, %v492_v39 }
  0xa5   : > { %v1246_v26 = vadd.f32 %v974_v29, %v798_v40  ;;  %v983_v23 = vsel %vm2960_vm12, %v980_v55, %v977_v30  ;;  %v1016_v34 = vmul.f32 %v2071_v4, %v1015_v57  ;;  %vm3005_vm0 = vcmp.lt.f32.partialorder %v1017_v15, 0.0004427343 }
  0xa6   : > { %v1279_v54 = vmul.f32 %v2743_v46, %v1245_v53  ;;  %v1247_v44 = vadd.f32 %v983_v23, %v799_v16  ;;  %v2081_v0 = vpop.eup %2080  ;;  %v992_v40 = vsel %vm2965_vm13, %v989_v35, %v986_v43  ;;  %v706_v37 = vadd.f32 %v498_v20, %v4235_v17 }
  0xa7   : > { %v1280_v25 = vmul.f32 %v2743_v46, %v1246_v26  ;;  %v1248_v16 = vadd.f32 %v992_v40, %v800_v24  ;;  %v995_v61 = vmul.f32 0.6931472, %v2081_v0  ;;  %v499_v24 = vadd.f32 1.0, %v2958_v11 }
  0xa8   : > { %v2997_v52 = vadd.f32 %v2752_v56, %v1279_v54  ;;  %v1281_v7 = vmul.f32 %v2743_v46, %v1247_v44  ;;  %v2083_v41 = vpop.eup %2082  ;;  %v505_v58 = vand.u32 2147483647, %v2958_v11  ;;  %v4236_v49 = vmax.f32 %v2888_v32, 0.0 }
  0xa9   : > { %v3003_v39 = vadd.f32 %v2752_v56, %v1280_v25  ;;  %v1282_v27 = vmul.f32 %v2743_v46, %v1248_v16  ;;  %v1001_v4 = vsel %vm2969_vm14, %v998_v9, %v995_v61  ;;  %v1004_v35 = vmul.f32 0.6931472, %v2083_v41 }
  0xaa   : > { %v1377_v55 = vand.u32 2147483647, %v2997_v52  ;;  %v3013_v8 = vadd.f32 %v2752_v56, %v1281_v7  ;;  %v1249_v30 = vadd.f32 %v1001_v4, %v4236_v49  ;;  %2090 = vlog2.f32 %v499_v24 }
  0xab   : > { %v1378_v28 = vand.u32 2147483647, %v3003_v39  ;;  %v2085_v59 = vpop.eup %2084  ;;  %v3023_v38 = vadd.f32 %v2752_v56, %v1282_v27  ;;  %v1010_v60 = vsel %vm2987_vm15, %v1007_v6, %v1004_v35  ;;  %v4237_v26 = vmax.f32 %v2898_v62, 0.0 }
  0xac   : > { %v1409_v63 = vsub.f32 0.0, %v1377_v55  ;;  %v1379_v19 = vand.u32 2147483647, %v3013_v8  ;;  %v1013_v9 = vmul.f32 0.6931472, %v2085_v59  ;;  %v2087_v51 = vpop.eup %2086  ;;  %v1283_v15 = vmul.f32 %v2743_v46, %v1249_v30 }
  0xad   : > { %v1410_v22 = vsub.f32 0.0, %v1378_v28  ;;  %v1380_v53 = vand.u32 2147483647, %v3023_v38  ;;  %v1250_v23 = vadd.f32 %v1010_v60, %v4237_v26  ;;  %v4238_v54 = vmax.f32 %v2909_v3, 0.0  ;;  %v3038_v45 = vpop.eup %2088 }
  0xae   : > { %v1441_v10 = vmul.f32 1.442695, %v1409_v63  ;;  %v1411_v12 = vsub.f32 0.0, %v1379_v19  ;;  %v1019_v32 = vsel %vm3005_vm0, %v1016_v34, %v1013_v9  ;;  %v3041_v20 = vadd.f32 %v2752_v56, %v1283_v15 }
  0xaf   : > { %v1443_v29 = vmul.f32 1.442695, %v1410_v22  ;;  %v1412_v57 = vsub.f32 0.0, %v1380_v53  ;;  %v1251_v44 = vadd.f32 %v1019_v32, %v4238_v54  ;;  %v1284_v0 = vmul.f32 %v2743_v46, %v1250_v23 }
  0xb0   : > { %2092 = vpow2.f32 %v1441_v10  ;;  %v1445_v43 = vmul.f32 1.442695, %v1411_v12  ;;  %v1020_v25 = vadd.f32 1.0, %v2087_v51  ;;  %v1023_v6 = vmul.f32 -0.5, %v2087_v51 }
  0xb1   : > { %2094 = vpow2.f32 %v1443_v29  ;;  %v1447_v62 = vmul.f32 1.442695, %v1412_v57  ;;  %v1285_v40 = vmul.f32 %v2743_v46, %v1251_v44  ;;  %v1381_v7 = vand.u32 2147483647, %v3041_v20 }
  0xb2   : > { %2096 = vpow2.f32 %v1445_v43  ;;  %v3047_v16 = vadd.f32 %v2752_v56, %v1284_v0  ;;  %v740_v3 = vmul.f32 %v2732_v36, %v706_v37  ;;  %v1345_v61 = vmax.f32 %v2997_v52, 0.0 }
  0xb3   : > { %2098 = vlog2.f32 %v1020_v25  ;;  %v3052_v41 = vadd.f32 %v2752_v56, %v1285_v40  ;;  %v503_v34 = vadd.f32 1.0, %v502_v50  ;;  %v1413_v13 = vsub.f32 0.0, %v1381_v7 }
  0xb4   : > { %2100 = vpow2.f32 %v1447_v62  ;;  %v1382_v17 = vand.u32 2147483647, %v3047_v16  ;;  %v1024_v55 = vadd.f32 1.0, %v1023_v6  ;;  %v1029_v27 = vadd.f32 1.0, %v3038_v45  ;;  %v2091_v19 = vpop.eup %2090 }
  0xb5   : > { %v1346_v24 = vmax.f32 %v3003_v39, 0.0  ;;  %v1347_v28 = vmax.f32 %v3013_v8, 0.0  ;;  %v1383_v4 = vand.u32 2147483647, %v3052_v41  ;;  %v1026_v37 = vand.u32 2147483647, %v2087_v51 }
  0xb6   : > { %v1348_v35 = vmax.f32 %v3023_v38, 0.0  ;;  %v1449_v59 = vmul.f32 1.442695, %v1413_v13  ;;  %v1414_v63 = vsub.f32 0.0, %v1382_v17  ;;  %2102 = vlog2.f32 %v1029_v27 }
  0xb7   : > { %v1349_v50 = vmax.f32 %v3041_v20, 0.0  ;;  %v1350_v22 = vmax.f32 %v3047_v16, 0.0  ;;  %v1415_v49 = vsub.f32 0.0, %v1383_v4  ;;  %v1032_v30 = vmul.f32 -0.5, %v3038_v45 }
  0xb8   : > { %2104 = vpow2.f32 %v1449_v59  ;;  %v1451_v60 = vmul.f32 1.442695, %v1414_v63  ;;  %v1351_v9 = vmax.f32 %v3052_v41, 0.0  ;;  %v3064_v10 = vmul.f32 %v2087_v51, %v1024_v55 }
  0xb9   : > { %v1453_v53 = vmul.f32 1.442695, %v1415_v49  ;;  %vm3066_vm1 = vcmp.lt.f32.partialorder %v1026_v37, 0.0004427343  ;;  %v1035_v15 = vand.u32 2147483647, %v3038_v45  ;;  %v3072_v26 = vadd.f32 %v2737_v42, %v740_v3 }
  0xba   : > { %v2093_v12 = vpop.eup %2092  ;;  %2106 = vpow2.f32 %v1451_v60  ;;  %v3074_v57 = vmul.f32 0.6931472, %v2091_v19  ;;  %v1033_v0 = vadd.f32 1.0, %v1032_v30  ;;  %v3077_v4 = vmul.f32 %v2958_v11, %v503_v34 }
  0xbb   : > { %v2095_v23 = vpop.eup %2094  ;;  %v1505_v32 = vadd.f32 1.0, %v2093_v12  ;;  %v1508_v43 = vmul.f32 -0.5, %v2093_v12  ;;  %2108 = vpow2.f32 %v1453_v53  ;;  %v1511_v62 = vand.u32 2147483647, %v2093_v12 }
  0xbc   : > { %v2097_v54 = vpop.eup %2096  ;;  %v1514_v51 = vadd.f32 1.0, %v2095_v23  ;;  %v1517_v44 = vmul.f32 -0.5, %v2095_v23  ;;  %v1520_v40 = vand.u32 2147483647, %v2095_v23  ;;  %vm3079_vm2 = vcmp.lt.f32.partialorder %v1035_v15, 0.0004427343 }
  0xbd   : > { %v2099_v25 = vpop.eup %2098  ;;  %2110 = vlog2.f32 %v1505_v32  ;;  %v1523_v6 = vadd.f32 1.0, %v2097_v54  ;;  %v1509_v13 = vadd.f32 1.0, %v1508_v43  ;;  %v1526_v17 = vmul.f32 -0.5, %v2097_v54 }
  0xbe   : > { %v2101_v7 = vpop.eup %2100  ;;  %2112 = vlog2.f32 %v1514_v51  ;;  %v1518_v3 = vadd.f32 1.0, %v1517_v44  ;;  %v1529_v55 = vand.u32 2147483647, %v2097_v54  ;;  %vm3084_vm3 = vcmp.lt.f32.partialorder %v1511_v62, 0.0004427343 }
  0xbf   : > { %2114 = vlog2.f32 %v1523_v6  ;;  %v1532_v27 = vadd.f32 1.0, %v2101_v7  ;;  %v1535_v37 = vmul.f32 -0.5, %v2101_v7  ;;  %v1538_v59 = vand.u32 2147483647, %v2101_v7 }
  0xc0   : > { %2116 = vpow2.f32 %v2938_v21  ;;  %v2103_v19 = vpop.eup %2102  ;;  %v1527_v30 = vadd.f32 1.0, %v1526_v17  ;;  %v1022_v60 = vmul.f32 0.6931472, %v2099_v25  ;;  %v1510_v53 = vmul.f32 %v2093_v12, %v1509_v13 }
  0xc1   : > { %2118 = vlog2.f32 %v1532_v27  ;;  %v1519_v32 = vmul.f32 %v2095_v23, %v1518_v3  ;;  %vm3088_vm4 = vcmp.lt.f32.partialorder %v1520_v40, 0.0004427343  ;;  %v1536_v15 = vadd.f32 1.0, %v1535_v37 }
  0xc2   : > { %v2105_v43 = vpop.eup %2104  ;;  %vm3092_vm5 = vcmp.lt.f32.partialorder %v1529_v55, 0.0004427343  ;;  %v1031_v21 = vmul.f32 0.6931472, %v2103_v19  ;;  %v1034_v44 = vmul.f32 %v3038_v45, %v1033_v0  ;;  %v838_v62 = vand.u32 2147483647, %v3072_v26 }
  0xc3   : > { %vm3098_vm6 = vcmp.lt.f32.partialorder %v1538_v59, 0.0004427343  ;;  %v1541_v12 = vadd.f32 1.0, %v2105_v43  ;;  %v1544_v23 = vmul.f32 -0.5, %v2105_v43  ;;  %v1028_v25 = vsel %vm3066_vm1, %v3064_v10, %v1022_v60 }
  0xc4   : > { %v2107_v40 = vpop.eup %2106  ;;  %v1528_v13 = vmul.f32 %v2097_v54, %v1527_v30  ;;  %v1547_v3 = vand.u32 2147483647, %v2105_v43  ;;  %vm3107_vm7 = vcmp.lt.f32.partialorder %v505_v58, 0.0004427343  ;;  %v293_v45 = vand.u32 2147483647, %v2784_v47 }
  0xc5   : > { %v2109_v0 = vpop.eup %2108  ;;  %v1537_v55 = vmul.f32 %v2101_v7, %v1536_v15  ;;  %2120 = vlog2.f32 %v1541_v12  ;;  %v1545_v27 = vadd.f32 1.0, %v1544_v23  ;;  %v1550_v37 = vadd.f32 1.0, %v2107_v40 }
  0xc6   : > { %v1559_v19 = vadd.f32 1.0, %v2109_v0  ;;  %v4253_v10 = vmax.f32 %v2936_v5, 0.0  ;;  %v1037_v54 = vsel %vm3079_vm2, %v1034_v44, %v1031_v21  ;;  %v870_v11 = vsub.f32 0.0, %v838_v62 }
  0xc7   : > { %v2111_v59 = vpop.eup %2110  ;;  %2122 = vlog2.f32 %v1550_v37  ;;  %v1553_v60 = vmul.f32 -0.5, %v2107_v40  ;;  %v507_v7 = vsel %vm3107_vm7, %v3077_v4, %v3074_v57  ;;  %vm3120_vm8 = vcmp.lt.f32.partialorder %v1547_v3, 0.0004427343 }
  0xc8   : > { %v1252_v29 = vadd.f32 %v1028_v25, %v4253_v10  ;;  %v2113_v58 = vpop.eup %2112  ;;  %v1507_v30 = vmul.f32 0.6931472, %v2111_v59  ;;  %v1556_v5 = vand.u32 2147483647, %v2107_v40  ;;  %2124 = vlog2.f32 %v1559_v19 }
  0xc9   : > { %v2115_v15 = vpop.eup %2114  ;;  %v1516_v12 = vmul.f32 0.6931472, %v2113_v58  ;;  %v1546_v62 = vmul.f32 %v2105_v43, %v1545_v27  ;;  %v1562_v25 = vmul.f32 -0.5, %v2109_v0  ;;  %v1565_v3 = vand.u32 2147483647, %v2109_v0 }
  0xca   : > { %v3124_v63 = vpop.eup %2116  ;;  %v1513_v21 = vsel %vm3084_vm3, %v1510_v53, %v1507_v30  ;;  %v1525_v44 = vmul.f32 0.6931472, %v2115_v15  ;;  %v1286_v17 = vmul.f32 %v2743_v46, %v1252_v29  ;;  %v1554_v19 = vadd.f32 1.0, %v1553_v60 }
  0xcb   : > { %v2119_v37 = vpop.eup %2118  ;;  %v1793_v57 = vadd.f32 %v1513_v21, %v1345_v61  ;;  %v1522_v4 = vsel %vm3088_vm4, %v1519_v32, %v1516_v12  ;;  %v4256_v39 = vmax.f32 %v2942_v33, 0.0  ;;  %v911_v32 = vmul.f32 1.442695, %v870_v11 }
  0xcc   : > { %v1794_v59 = vadd.f32 %v1522_v4, %v1346_v24  ;;  %v1531_v49 = vsel %vm3092_vm5, %v1528_v13, %v1525_v44  ;;  %v1534_v53 = vmul.f32 0.6931472, %v2119_v37  ;;  %v3145_v61 = vadd.f32 %v2752_v56, %v1286_v17 }
  0xcd   : > { %1825 = vst [vmem:[%s3139_s19] sm:$0xff] %v1793_v57  ;;  %v1795_v52 = vadd.f32 %v1531_v49, %v1347_v28  ;;  %v1253_v24 = vadd.f32 %v1037_v54, %v4256_v39  ;;  %v1563_v43 = vadd.f32 1.0, %v1562_v25  ;;  %v4257_v51 = vmax.f32 %v2770_v14, 0.0 }
  0xce   : > { %1826 = vst [vmem:[%s3139_s19 + $0x8] sm:$0xff] %v1794_v59  ;;  %v1540_v34 = vsel %vm3098_vm6, %v1537_v55, %v1534_v53  ;;  %v508_v27 = vadd.f32 1.0, %v3124_v63  ;;  %v1384_v28 = vand.u32 2147483647, %v3145_v61  ;;  %v511_v10 = vmul.f32 -0.5, %v3124_v63 }
  0xcf   : > { %v707_v13 = vadd.f32 %v507_v7, %v4257_v51  ;;  %1827 = vst [vmem:[%s3139_s19 + $0x10] sm:$0xff] %v1795_v52  ;;  %v1796_v8 = vadd.f32 %v1540_v34, %v1348_v35  ;;  %v1287_v33 = vmul.f32 %v2743_v46, %v1253_v24  ;;  %v2121_v29 = vpop.eup %2120  ;;  %v1555_v54 = vmul.f32 %v2107_v40, %v1554_v19  ;;  %v165_v24 = vld [vmem:[%s2668_s17 + $0x80] sm:$0xff] }
  0xd0   : > { %vm3161_vm9 = vcmp.lt.f32.partialorder %v1556_v5, 0.0004427343  ;;  %2126 = vpow2.f32 %v911_v32  ;;  %v1543_v55 = vmul.f32 0.6931472, %v2121_v29  ;;  %v1416_v11 = vsub.f32 0.0, %v1384_v28 }
  0xd1   : > { %v741_v14 = vmul.f32 %v2732_v36, %v707_v13  ;;  %1828 = vst [vmem:[%s3139_s19 + $0x18] sm:$0xff] %v1796_v8  ;;  %v3168_v38 = vadd.f32 %v2752_v56, %v1287_v33  ;;  %2128 = vlog2.f32 %v508_v27  ;;  %v2123_v35 = vpop.eup %2122  ;;  %v1564_v58 = vmul.f32 %v2109_v0, %v1563_v43 }
  0xd2   : > { %vm3170_vm10 = vcmp.lt.f32.partialorder %v1565_v3, 0.0004427343  ;;  %v325_v60 = vsub.f32 0.0, %v293_v45  ;;  %v2125_v7 = vpop.eup %2124  ;;  %v1549_v15 = vsel %vm3120_vm8, %v1546_v62, %v1543_v55  ;;  %v1552_v12 = vmul.f32 0.6931472, %v2123_v35  ;;  %v164_v62 = vld [vmem:[%s2668_s17 + $0x78] sm:$0xff] }
  0xd3   : > { %v3175_v40 = vadd.f32 %v2737_v42, %v741_v14  ;;  %v1455_v5 = vmul.f32 1.442695, %v1416_v11  ;;  %v512_v21 = vadd.f32 1.0, %v511_v10  ;;  %v1797_v0 = vadd.f32 %v1549_v15, %v1349_v50 }
  0xd4   : > { %v1561_v44 = vmul.f32 0.6931472, %v2125_v7  ;;  %v1385_v25 = vand.u32 2147483647, %v3168_v38  ;;  %v514_v37 = vand.u32 2147483647, %v3124_v63  ;;  %v1558_v57 = vsel %vm3161_vm9, %v1555_v54, %v1552_v12 }
  0xd5   : > { %2130 = vpow2.f32 %v1455_v5  ;;  %v839_v45 = vand.u32 2147483647, %v3175_v40  ;;  %v369_v23 = vmul.f32 1.442695, %v325_v60  ;;  %1829 = vst [vmem:[%s3139_s19 + $0x20] sm:$0xff] %v1797_v0  ;;  %v1798_v20 = vadd.f32 %v1558_v57, %v1350_v22 }
  0xd6   : > { %v1567_v50 = vsel %vm3170_vm10, %v1564_v58, %v1561_v44  ;;  %v1417_v4 = vsub.f32 0.0, %v1385_v25  ;;  %v3196_v3 = vadd.f32 %v2677_v2, %v2787_v48  ;;  %v3202_v49 = vadd.f32 %v2677_v2, %v2906_v18  ;;  %v166_v58 = vld [vmem:[%s2668_s17 + $0x88] sm:$0xff] }
  0xd7   : > { %v1799_v17 = vadd.f32 %v1567_v50, %v1351_v9  ;;  %v871_v59 = vsub.f32 0.0, %v839_v45  ;;  %2132 = vpow2.f32 %v369_v23  ;;  %1830 = vst [vmem:[%s3139_s19 + $0x28] sm:$0xff] %v1798_v20  ;;  %v198_v53 = vmul.f32 %v2675_v1, %v164_v62 }
  0xd8   : > { %v1457_v16 = vmul.f32 1.442695, %v1417_v4  ;;  %v294_v22 = vand.u32 2147483647, %v3196_v3  ;;  %v260_v48 = vmax.f32 %v2779_v31, 0.0  ;;  %v513_v52 = vmul.f32 %v3124_v63, %v512_v21 }
  0xd9   : > { %1831 = vst [vmem:[%s3139_s19 + $0x30] sm:$0xff] %v1799_v17  ;;  %v913_v19 = vmul.f32 1.442695, %v871_v59  ;;  %v295_v41 = vand.u32 2147483647, %v3202_v49  ;;  %v3212_v18 = vadd.f32 %v2677_v2, %v198_v53  ;;  %v261_v31 = vmax.f32 %v2784_v47, 0.0 }
  0xda   : > { %v2127_v9 = vpop.eup %2126  ;;  %2134 = vpow2.f32 %v1457_v16  ;;  %v326_v39 = vsub.f32 0.0, %v294_v22  ;;  %vm3215_vm11 = vcmp.lt.f32.partialorder %v514_v37, 0.0004427343  ;;  %v806_v63 = vmax.f32 %v3072_v26, 0.0 }
  0xdb   : > { %v2129_v32 = vpop.eup %2128  ;;  %v1038_v34 = vadd.f32 1.0, %v2127_v9  ;;  %2136 = vpow2.f32 %v913_v19  ;;  %v1041_v51 = vmul.f32 -0.5, %v2127_v9  ;;  %v327_v8 = vsub.f32 0.0, %v295_v41 }
  0xdc   : > { %v510_v13 = vmul.f32 0.6931472, %v2129_v32  ;;  %v371_v27 = vmul.f32 1.442695, %v326_v39  ;;  %v296_v28 = vand.u32 2147483647, %v3212_v18  ;;  %v199_v33 = vmul.f32 %v2675_v1, %v165_v24 }
  0xdd   : > { %2138 = vlog2.f32 %v1038_v34  ;;  %v1352_v10 = vmax.f32 %v3145_v61, 0.0  ;;  %v373_v54 = vmul.f32 1.442695, %v327_v8  ;;  %v1353_v14 = vmax.f32 %v3168_v38, 0.0 }
  0xde   : > { %v516_v29 = vsel %vm3215_vm11, %v513_v52, %v510_v13  ;;  %2140 = vpow2.f32 %v371_v27  ;;  %v807_v55 = vmax.f32 %v3175_v40, 0.0  ;;  %v328_v35 = vsub.f32 0.0, %v296_v28 }
  0xdf   : > { %v2131_v6 = vpop.eup %2130  ;;  %v708_v11 = vadd.f32 %v516_v29, %v260_v48  ;;  %v1042_v60 = vadd.f32 1.0, %v1041_v51  ;;  %v1044_v7 = vand.u32 2147483647, %v2127_v9  ;;  %2142 = vpow2.f32 %v373_v54 }
  0xe0   : > { %v1568_v30 = vadd.f32 1.0, %v2131_v6  ;;  %v1571_v12 = vmul.f32 -0.5, %v2131_v6  ;;  %v375_v21 = vmul.f32 1.442695, %v328_v35  ;;  %v3231_v0 = vadd.f32 %v2677_v2, %v199_v33 }
  0xe1   : > { %v2133_v15 = vpop.eup %2132  ;;  %v742_v5 = vmul.f32 %v2732_v36, %v708_v11  ;;  %v262_v25 = vmax.f32 %v3196_v3, 0.0  ;;  %v200_v37 = vmul.f32 %v2675_v1, %v166_v58  ;;  %v1574_v57 = vand.u32 2147483647, %v2131_v6 }
  0xe2   : > { %2144 = vlog2.f32 %v1568_v30  ;;  %v517_v44 = vadd.f32 1.0, %v2133_v15  ;;  %v263_v23 = vmax.f32 %v3202_v49, 0.0  ;;  %v1043_v20 = vmul.f32 %v2127_v9, %v1042_v60 }
  0xe3   : > { %v3236_v45 = vadd.f32 %v2737_v42, %v742_v5  ;;  %2146 = vpow2.f32 %v375_v21  ;;  %vm3239_vm12 = vcmp.lt.f32.partialorder %v1044_v7, 0.0004427343  ;;  %v264_v4 = vmax.f32 %v3212_v18, 0.0 }
  0xe4   : > { %v2135_v62 = vpop.eup %2134  ;;  %2148 = vlog2.f32 %v517_v44  ;;  %v1572_v59 = vadd.f32 1.0, %v1571_v12  ;;  %v520_v22 = vmul.f32 -0.5, %v2133_v15  ;;  %v297_v53 = vand.u32 2147483647, %v3231_v0 }
  0xe5   : > { %v2137_v17 = vpop.eup %2136  ;;  %v1577_v16 = vadd.f32 1.0, %v2135_v62  ;;  %v840_v48 = vand.u32 2147483647, %v3236_v45  ;;  %v265_v41 = vmax.f32 %v3231_v0, 0.0  ;;  %v3248_v9 = vadd.f32 %v2677_v2, %v200_v37 }
  0xe6   : > { %v1047_v19 = vadd.f32 1.0, %v2137_v17  ;;  %vm3250_vm13 = vcmp.lt.f32.partialorder %v1574_v57, 0.0004427343  ;;  %v1580_v24 = vmul.f32 -0.5, %v2135_v62  ;;  %v523_v32 = vand.u32 2147483647, %v2133_v15 }
  0xe7   : > { %v2139_v52 = vpop.eup %2138  ;;  %2150 = vlog2.f32 %v1577_v16  ;;  %v1583_v43 = vand.u32 2147483647, %v2135_v62  ;;  %v1050_v13 = vmul.f32 -0.5, %v2137_v17  ;;  %v1573_v27 = vmul.f32 %v2131_v6, %v1572_v59 }
  0xe8   : > { %v3254_v34 = vpop.eup %2140  ;;  %v1040_v51 = vmul.f32 0.6931472, %v2139_v52  ;;  %2152 = vlog2.f32 %v1047_v19  ;;  %v872_v8 = vsub.f32 0.0, %v840_v48  ;;  %v521_v28 = vadd.f32 1.0, %v520_v22 }
  0xe9   : > { %v329_v33 = vsub.f32 0.0, %v297_v53  ;;  %v3256_v29 = vpop.eup %2142  ;;  %v1053_v11 = vand.u32 2147483647, %v2137_v17  ;;  %v526_v35 = vadd.f32 1.0, %v3254_v34  ;;  %v266_v58 = vmax.f32 %v3248_v9, 0.0 }
  0xea   : > { %v1046_v54 = vsel %vm3239_vm12, %v1043_v20, %v1040_v51  ;;  %v1581_v30 = vadd.f32 1.0, %v1580_v24  ;;  %v915_v7 = vmul.f32 1.442695, %v872_v8  ;;  %v535_v6 = vadd.f32 1.0, %v3256_v29 }
  0xeb   : > { %v1254_v60 = vadd.f32 %v1046_v54, %v806_v63  ;;  %vm3265_vm14 = vcmp.lt.f32.partialorder %v1583_v43, 0.0004427343  ;;  %v1051_v21 = vadd.f32 1.0, %v1050_v13  ;;  %2154 = vlog2.f32 %v526_v35 }
  0xec   : > { %v2145_v12 = vpop.eup %2144  ;;  %v529_v44 = vmul.f32 -0.5, %v3254_v34  ;;  %2156 = vpow2.f32 %v915_v7  ;;  %v522_v26 = vmul.f32 %v2133_v15, %v521_v28  ;;  %vm3273_vm15 = vcmp.lt.f32.partialorder %v1053_v11, 0.0004427343 }
  0xed   : > { %v3270_v37 = vpop.eup %2146  ;;  %v1570_v57 = vmul.f32 0.6931472, %v2145_v12  ;;  %v1288_v20 = vmul.f32 %v2743_v46, %v1254_v60  ;;  %vm3277_vm0 = vcmp.lt.f32.partialorder %v523_v32, 0.0004427343  ;;  %2158 = vlog2.f32 %v535_v6 }
  0xee   : > { %v2149_v63 = vpop.eup %2148  ;;  %v538_v16 = vmul.f32 -0.5, %v3256_v29  ;;  %v544_v19 = vadd.f32 1.0, %v3270_v37  ;;  %v1582_v52 = vmul.f32 %v2135_v62, %v1581_v30  ;;  %v1052_v24 = vmul.f32 %v2137_v17, %v1051_v21 }
  0xef   : > { %v1576_v22 = vsel %vm3250_vm13, %v1573_v27, %v1570_v57  ;;  %v3285_v53 = vadd.f32 %v2752_v56, %v1288_v20  ;;  %v519_v15 = vmul.f32 0.6931472, %v2149_v63  ;;  %v530_v32 = vadd.f32 1.0, %v529_v44  ;;  %v167_v44 = vld [vmem:[%s2668_s17 + $0x90] sm:$0xff] }
  0xf0   : > { %v1800_v48 = vadd.f32 %v1576_v22, %v1352_v10  ;;  %v532_v39 = vand.u32 2147483647, %v3254_v34  ;;  %2160 = vlog2.f32 %v544_v19  ;;  %v541_v61 = vand.u32 2147483647, %v3256_v29 }
  0xf1   : > { %v2151_v43 = vpop.eup %2150  ;;  %v1386_v51 = vand.u32 2147483647, %v3285_v53  ;;  %v525_v13 = vsel %vm3277_vm0, %v522_v26, %v519_v15  ;;  %v547_v10 = vmul.f32 -0.5, %v3270_v37  ;;  %v539_v54 = vadd.f32 1.0, %v538_v16 }
  0xf2   : > { %v2153_v27 = vpop.eup %2152  ;;  %1832 = vst [vmem:[%s3139_s19 + $0x38] sm:$0xff] %v1800_v48  ;;  %v1579_v8 = vmul.f32 0.6931472, %v2151_v43  ;;  %v709_v28 = vadd.f32 %v525_v13, %v261_v31  ;;  %v377_v11 = vmul.f32 1.442695, %v329_v33  ;;  %v531_v60 = vmul.f32 %v3254_v34, %v530_v32 }
  0xf3   : > { %v1418_v62 = vsub.f32 0.0, %v1386_v51  ;;  %v1049_v17 = vmul.f32 0.6931472, %v2153_v27  ;;  %v298_v47 = vand.u32 2147483647, %v3248_v9  ;;  %v548_v34 = vadd.f32 1.0, %v547_v10 }
  0xf4   : > { %v1585_v35 = vsel %vm3265_vm14, %v1582_v52, %v1579_v8  ;;  %v743_v30 = vmul.f32 %v2732_v36, %v709_v28  ;;  %2162 = vpow2.f32 %v377_v11  ;;  %vm3313_vm1 = vcmp.lt.f32.partialorder %v532_v39, 0.0004427343 }
  0xf5   : > { %v1801_v31 = vadd.f32 %v1585_v35, %v1353_v14  ;;  %v1459_v7 = vmul.f32 1.442695, %v1418_v62  ;;  %v1055_v6 = vsel %vm3273_vm15, %v1052_v24, %v1049_v17  ;;  %v2155_v12 = vpop.eup %2154  ;;  %v540_v57 = vmul.f32 %v3256_v29, %v539_v54  ;;  %v168_v17 = vld [vmem:[%s2668_s17 + $0x98] sm:$0xff] }
  0xf6   : > { %v1255_v33 = vadd.f32 %v1055_v6, %v807_v55  ;;  %v3311_v5 = vadd.f32 %v2737_v42, %v743_v30  ;;  %v3318_v38 = vpop.eup %2156  ;;  %v528_v14 = vmul.f32 0.6931472, %v2155_v12  ;;  %v330_v20 = vsub.f32 0.0, %v298_v47 }
  0xf7   : > { %1833 = vst [vmem:[%s3139_s19 + $0x40] sm:$0xff] %v1801_v31  ;;  %2164 = vpow2.f32 %v1459_v7  ;;  %v2159_v26 = vpop.eup %2158  ;;  %v1056_v55 = vadd.f32 1.0, %v3318_v38  ;;  %vm3324_vm2 = vcmp.lt.f32.partialorder %v541_v61, 0.0004427343  ;;  %v550_v50 = vand.u32 2147483647, %v3270_v37 }
  0xf8   : > { %v1289_v40 = vmul.f32 %v2743_v46, %v1255_v33  ;;  %v841_v59 = vand.u32 2147483647, %v3311_v5  ;;  %v534_v16 = vsel %vm3313_vm1, %v531_v60, %v528_v14  ;;  %v537_v22 = vmul.f32 0.6931472, %v2159_v26 }
  0xf9   : > { %v201_v29 = vmul.f32 %v2675_v1, %v167_v44  ;;  %2166 = vlog2.f32 %v1056_v55  ;;  %v1059_v19 = vmul.f32 -0.5, %v3318_v38  ;;  %v549_v48 = vmul.f32 %v3270_v37, %v548_v34 }
  0xfa   : > { %v3334_v15 = vadd.f32 %v2752_v56, %v1289_v40  ;;  %v2161_v52 = vpop.eup %2160  ;;  %v873_v24 = vsub.f32 0.0, %v841_v59  ;;  %v710_v32 = vadd.f32 %v534_v16, %v262_v25  ;;  %v543_v43 = vsel %vm3324_vm2, %v540_v57, %v537_v22 }
  0xfb   : > { %v379_v51 = vmul.f32 1.442695, %v330_v20  ;;  %v808_v39 = vmax.f32 %v3236_v45, 0.0  ;;  %v711_v27 = vadd.f32 %v543_v43, %v263_v23  ;;  %vm3346_vm3 = vcmp.lt.f32.partialorder %v550_v50, 0.0004427343  ;;  %v169_v45 = vld [vmem:[%s2668_s17 + $0xa0] sm:$0xff] }
  0xfc   : > { %v1387_v13 = vand.u32 2147483647, %v3334_v15  ;;  %v917_v8 = vmul.f32 1.442695, %v873_v24  ;;  %v744_v3 = vmul.f32 %v2732_v36, %v710_v32  ;;  %v546_v25 = vmul.f32 0.6931472, %v2161_v52 }
  0xfd   : > { %2168 = vpow2.f32 %v379_v51  ;;  %v1354_v28 = vmax.f32 %v3285_v53, 0.0  ;;  %v1060_v10 = vadd.f32 1.0, %v1059_v19  ;;  %v745_v62 = vmul.f32 %v2732_v36, %v711_v27 }
  0xfe   : > { %v1419_v61 = vsub.f32 0.0, %v1387_v13  ;;  %v3355_v54 = vpop.eup %2162  ;;  %2170 = vpow2.f32 %v917_v8  ;;  %v3358_v49 = vadd.f32 %v2737_v42, %v744_v3  ;;  %v552_v23 = vsel %vm3346_vm3, %v549_v48, %v546_v25 }
  0xff   : > { %v3363_v11 = vadd.f32 %v2677_v2, %v201_v29  ;;  %v1062_v30 = vand.u32 2147483647, %v3318_v38  ;;  %v3367_v60 = vadd.f32 %v2737_v42, %v745_v62  ;;  %v712_v47 = vadd.f32 %v552_v23, %v264_v4 }
 0x100   : > { %v1461_v35 = vmul.f32 1.442695, %v1419_v61  ;;  %v809_v7 = vmax.f32 %v3311_v5, 0.0  ;;  %v842_v6 = vand.u32 2147483647, %v3358_v49  ;;  %v202_v12 = vmul.f32 %v2675_v1, %v168_v17 }
 0x101   : > { %v2165_v31 = vpop.eup %2164  ;;  %v3375_v33 = vmul.f32 %v2675_v1, %v169_v45  ;;  %v1061_v34 = vmul.f32 %v3318_v38, %v1060_v10  ;;  %v553_v44 = vadd.f32 1.0, %v3355_v54  ;;  %v843_v18 = vand.u32 2147483647, %v3367_v60 }
 0x102   : > { %v1586_v21 = vadd.f32 1.0, %v2165_v31  ;;  %2172 = vpow2.f32 %v1461_v35  ;;  %v1589_v14 = vmul.f32 -0.5, %v2165_v31  ;;  %v874_v57 = vsub.f32 0.0, %v842_v6 }
 0x103   : > { %v746_v4 = vmul.f32 %v2732_v36, %v712_v47  ;;  %v2167_v20 = vpop.eup %2166  ;;  %v1355_v26 = vmax.f32 %v3334_v15, 0.0  ;;  %vm1063_vm4 = vcmp.lt.f32.partialorder %v1062_v30, 0.0004427343  ;;  %v267_v40 = vmax.f32 %v3363_v11, 0.0 }
 0x104   : > { %2174 = vlog2.f32 %v1586_v21  ;;  %v1058_v55 = vmul.f32 0.6931472, %v2167_v20  ;;  %v919_v63 = vmul.f32 1.442695, %v874_v57  ;;  %v875_v50 = vsub.f32 0.0, %v843_v18 }
 0x105   : > { %v3384_v38 = vadd.f32 %v2737_v42, %v746_v4  ;;  %v1592_v59 = vand.u32 2147483647, %v2165_v31  ;;  %2176 = vlog2.f32 %v553_v44  ;;  %v556_v16 = vmul.f32 -0.5, %v3355_v54 }
 0x106   : > { %v299_v22 = vand.u32 2147483647, %v3363_v11  ;;  %v1590_v19 = vadd.f32 1.0, %v1589_v14  ;;  %v1064_v48 = vsel %vm1063_vm4, %v1061_v34, %v1058_v55  ;;  %2178 = vpow2.f32 %v919_v63 }
 0x107   : > { %v2169_v29 = vpop.eup %2168  ;;  %v921_v52 = vmul.f32 1.442695, %v875_v50  ;;  %v1256_v24 = vadd.f32 %v1064_v48, %v808_v39  ;;  %v844_v32 = vand.u32 2147483647, %v3384_v38  ;;  %v559_v43 = vand.u32 2147483647, %v3355_v54 }
 0x108   : > { %v562_v51 = vadd.f32 1.0, %v2169_v29  ;;  %v2171_v13 = vpop.eup %2170  ;;  %v810_v27 = vmax.f32 %v3358_v49, 0.0  ;;  %v811_v37 = vmax.f32 %v3367_v60, 0.0  ;;  %v3393_v8 = vadd.f32 %v2677_v2, %v202_v12 }
 0x109   : > { %2180 = vpow2.f32 %v921_v52  ;;  %vm3395_vm5 = vcmp.lt.f32.partialorder %v1592_v59, 0.0004427343  ;;  %v1290_v39 = vmul.f32 %v2743_v46, %v1256_v24  ;;  %v1065_v25 = vadd.f32 1.0, %v2171_v13 }
 0x10a   : > { %v557_v61 = vadd.f32 1.0, %v556_v16  ;;  %v1591_v10 = vmul.f32 %v2165_v31, %v1590_v19  ;;  %v876_v62 = vsub.f32 0.0, %v844_v32  ;;  %2182 = vlog2.f32 %v562_v51 }
 0x10b   : > { %v565_v17 = vmul.f32 -0.5, %v2169_v29  ;;  %v3401_v23 = vadd.f32 %v2752_v56, %v1290_v39  ;;  %2184 = vlog2.f32 %v1065_v25  ;;  %vm3403_vm6 = vcmp.lt.f32.partialorder %v559_v43, 0.0004427343 }
 0x10c   : > { %v2173_v45 = vpop.eup %2172  ;;  %v331_v30 = vsub.f32 0.0, %v299_v22  ;;  %v1068_v6 = vmul.f32 -0.5, %v2171_v13  ;;  %v923_v12 = vmul.f32 1.442695, %v876_v62  ;;  %v568_v21 = vand.u32 2147483647, %v2169_v29 }
 0x10d   : > { %v1595_v47 = vadd.f32 1.0, %v2173_v45  ;;  %v1388_v31 = vand.u32 2147483647, %v3401_v23  ;;  %v1071_v44 = vand.u32 2147483647, %v2171_v13  ;;  %v812_v14 = vmax.f32 %v3384_v38, 0.0 }
 0x10e   : > { %v2175_v34 = vpop.eup %2174  ;;  %v558_v57 = vmul.f32 %v3355_v54, %v557_v61  ;;  %v1598_v4 = vmul.f32 -0.5, %v2173_v45  ;;  %v566_v20 = vadd.f32 1.0, %v565_v17  ;;  %v381_v50 = vmul.f32 1.442695, %v331_v30 }
 0x10f   : > { %v1588_v18 = vmul.f32 0.6931472, %v2175_v34  ;;  %2186 = vlog2.f32 %v1595_v47  ;;  %v2177_v55 = vpop.eup %2176  ;;  %v1420_v63 = vsub.f32 0.0, %v1388_v31  ;;  %v300_v59 = vand.u32 2147483647, %v3393_v8 }
 0x110   : > { %2188 = vpow2.f32 %v923_v12  ;;  %v2179_v16 = vpop.eup %2178  ;;  %v1069_v19 = vadd.f32 1.0, %v1068_v6  ;;  %v555_v48 = vmul.f32 0.6931472, %v2177_v55  ;;  %vm3413_vm7 = vcmp.lt.f32.partialorder %v568_v21, 0.0004427343 }
 0x111   : > { %v1594_v22 = vsel %vm3395_vm5, %v1591_v10, %v1588_v18  ;;  %v1601_v24 = vand.u32 2147483647, %v2173_v45  ;;  %v1463_v32 = vmul.f32 1.442695, %v1420_v63  ;;  %v1074_v43 = vadd.f32 1.0, %v2179_v16 }
 0x112   : > { %v1802_v54 = vadd.f32 %v1594_v22, %v1354_v28  ;;  %v561_v39 = vsel %vm3403_vm6, %v558_v57, %v555_v48  ;;  %v567_v25 = vmul.f32 %v2169_v29, %v566_v20  ;;  %2190 = vpow2.f32 %v381_v50 }
 0x113   : > { %v2181_v51 = vpop.eup %2180  ;;  %v332_v3 = vsub.f32 0.0, %v300_v59  ;;  %v1599_v61 = vadd.f32 1.0, %v1598_v4  ;;  %2192 = vpow2.f32 %v1463_v32  ;;  %v1077_v10 = vmul.f32 -0.5, %v2179_v16 }
 0x114   : > { %1834 = vst [vmem:[%s3139_s19 + $0x48] sm:$0xff] %v1802_v54  ;;  %v1083_v62 = vadd.f32 1.0, %v2181_v51  ;;  %v2183_v17 = vpop.eup %2182  ;;  %v1070_v30 = vmul.f32 %v2171_v13, %v1069_v19  ;;  %vm3422_vm8 = vcmp.lt.f32.partialorder %v1071_v44, 0.0004427343  ;;  %2194 = vlog2.f32 %v1074_v43 }
 0x115   : > { %v713_v28 = vadd.f32 %v561_v39, %v265_v41  ;;  %v2185_v35 = vpop.eup %2184  ;;  %v1080_v47 = vand.u32 2147483647, %v2179_v16  ;;  %v564_v29 = vmul.f32 0.6931472, %v2183_v17  ;;  %v3430_v6 = vadd.f32 %v2677_v2, %v3375_v33 }
 0x116   : > { %2196 = vlog2.f32 %v1083_v62  ;;  %v1067_v12 = vmul.f32 0.6931472, %v2185_v35  ;;  %v1086_v21 = vmul.f32 -0.5, %v2181_v51  ;;  %v383_v34 = vmul.f32 1.442695, %v332_v3 }
 0x117   : > { %v747_v13 = vmul.f32 %v2732_v36, %v713_v28  ;;  %v1600_v31 = vmul.f32 %v2173_v45, %v1599_v61  ;;  %vm3433_vm9 = vcmp.lt.f32.partialorder %v1601_v24, 0.0004427343  ;;  %v1078_v0 = vadd.f32 1.0, %v1077_v10 }
 0x118   : > { %v570_v41 = vsel %vm3413_vm7, %v567_v25, %v564_v29  ;;  %v1073_v18 = vsel %vm3422_vm8, %v1070_v30, %v1067_v12  ;;  %2198 = vpow2.f32 %v383_v34  ;;  %v1089_v63 = vand.u32 2147483647, %v2181_v51 }
 0x119   : > { %v2187_v57 = vpop.eup %2186  ;;  %v3442_v33 = vadd.f32 %v2737_v42, %v747_v13  ;;  %v714_v4 = vadd.f32 %v570_v41, %v266_v58  ;;  %v1257_v55 = vadd.f32 %v1073_v18, %v809_v7  ;;  %v268_v50 = vmax.f32 %v3393_v8, 0.0 }
 0x11a   : > { %v2189_v45 = vpop.eup %2188  ;;  %v1597_v20 = vmul.f32 0.6931472, %v2187_v57  ;;  %vm3449_vm10 = vcmp.lt.f32.partialorder %v1080_v47, 0.0004427343  ;;  %v1087_v22 = vadd.f32 1.0, %v1086_v21  ;;  %v1079_v24 = vmul.f32 %v2179_v16, %v1078_v0 }
 0x11b   : > { %v1092_v19 = vadd.f32 1.0, %v2189_v45  ;;  %v301_v48 = vand.u32 2147483647, %v3430_v6  ;;  %v1291_v58 = vmul.f32 %v2743_v46, %v1257_v55  ;;  %v845_v5 = vand.u32 2147483647, %v3442_v33 }
 0x11c   : > { %v1603_v9 = vsel %vm3433_vm9, %v1600_v31, %v1597_v20  ;;  %v748_v7 = vmul.f32 %v2732_v36, %v714_v4  ;;  %v3459_v52 = vpop.eup %2190  ;;  %v1095_v32 = vmul.f32 -0.5, %v2189_v45  ;;  %vm3466_vm11 = vcmp.lt.f32.partialorder %v1089_v63, 0.0004427343 }
 0x11d   : > { %v1803_v54 = vadd.f32 %v1603_v9, %v1355_v26  ;;  %2200 = vlog2.f32 %v1092_v19  ;;  %v2193_v43 = vpop.eup %2192  ;;  %v3464_v39 = vadd.f32 %v2752_v56, %v1291_v58  ;;  %v877_v3 = vsub.f32 0.0, %v845_v5  ;;  %v170_v19 = vld [vmem:[%s2668_s17 + $0xa8] sm:$0xff] }
 0x11e   : > { %v3471_v61 = vadd.f32 %v2737_v42, %v748_v7  ;;  %v2195_v10 = vpop.eup %2194  ;;  %v1604_v62 = vadd.f32 1.0, %v2193_v43  ;;  %v1088_v15 = vmul.f32 %v2181_v51, %v1087_v22  ;;  %v1098_v26 = vand.u32 2147483647, %v2189_v45 }
 0x11f   : > { %1835 = vst [vmem:[%s3139_s19 + $0x50] sm:$0xff] %v1803_v54  ;;  %v571_v16 = vadd.f32 1.0, %v3459_v52  ;;  %v1356_v30 = vmax.f32 %v3401_v23, 0.0  ;;  %v1389_v53 = vand.u32 2147483647, %v3464_v39  ;;  %v333_v35 = vsub.f32 0.0, %v301_v48 }
 0x120   : > { %v2197_v17 = vpop.eup %2196  ;;  %v1076_v28 = vmul.f32 0.6931472, %v2195_v10  ;;  %2202 = vlog2.f32 %v1604_v62  ;;  %v1607_v47 = vmul.f32 -0.5, %v2193_v43  ;;  %v1096_v12 = vadd.f32 1.0, %v1095_v32 }
 0x121   : > { %v1085_v29 = vmul.f32 0.6931472, %v2197_v17  ;;  %v1421_v21 = vsub.f32 0.0, %v1389_v53  ;;  %v925_v34 = vmul.f32 1.442695, %v877_v3  ;;  %2204 = vlog2.f32 %v571_v16 }
 0x122   : > { %v1082_v13 = vsel %vm3449_vm10, %v1079_v24, %v1076_v28  ;;  %v846_v51 = vand.u32 2147483647, %v3471_v61  ;;  %v3480_v31 = vpop.eup %2198  ;;  %vm3486_vm12 = vcmp.lt.f32.partialorder %v1098_v26, 0.0004427343  ;;  %v1097_v55 = vmul.f32 %v2189_v45, %v1096_v12 }
 0x123   : > { %v1258_v44 = vadd.f32 %v1082_v13, %v810_v27  ;;  %v1091_v0 = vsel %vm3466_vm11, %v1088_v15, %v1085_v29  ;;  %v1465_v57 = vmul.f32 1.442695, %v1421_v21  ;;  %2206 = vpow2.f32 %v925_v34 }
 0x124   : > { %v1259_v18 = vadd.f32 %v1091_v0, %v811_v37  ;;  %v878_v4 = vsub.f32 0.0, %v846_v51  ;;  %v574_v49 = vmul.f32 -0.5, %v3459_v52  ;;  %v580_v27 = vadd.f32 1.0, %v3480_v31 }
 0x125   : > { %v1292_v20 = vmul.f32 %v2743_v46, %v1258_v44  ;;  %v1608_v63 = vadd.f32 1.0, %v1607_v47  ;;  %2208 = vpow2.f32 %v1465_v57  ;;  %v1610_v9 = vand.u32 2147483647, %v2193_v43 }
 0x126   : > { %v1293_v59 = vmul.f32 %v2743_v46, %v1259_v18  ;;  %v927_v22 = vmul.f32 1.442695, %v878_v4  ;;  %v577_v37 = vand.u32 2147483647, %v3459_v52  ;;  %2210 = vlog2.f32 %v580_v27 }
 0x127   : > { %v2201_v48 = vpop.eup %2200  ;;  %v3498_v60 = vadd.f32 %v2752_v56, %v1292_v20  ;;  %v583_v5 = vmul.f32 -0.5, %v3480_v31  ;;  %v575_v54 = vadd.f32 1.0, %v574_v49  ;;  %v269_v24 = vmax.f32 %v3430_v6, 0.0 }
 0x128   : > { %v3502_v45 = vadd.f32 %v2752_v56, %v1293_v59  ;;  %v1094_v58 = vmul.f32 0.6931472, %v2201_v48  ;;  %2212 = vpow2.f32 %v927_v22  ;;  %v204_v32 = vmul.f32 %v2675_v1, %v170_v19 }
 0x129   : > { %v1390_v7 = vand.u32 2147483647, %v3498_v60  ;;  %v1609_v25 = vmul.f32 %v2193_v43, %v1608_v63  ;;  %v813_v62 = vmax.f32 %v3442_v33, 0.0  ;;  %vm3512_vm13 = vcmp.lt.f32.partialorder %v1610_v9, 0.0004427343  ;;  %v175_v33 = vld [vmem:[%s2668_s17 + $0xd0] sm:$0xff] }
 0x12a   : > { %v1391_v3 = vand.u32 2147483647, %v3502_v45  ;;  %v1100_v10 = vsel %vm3486_vm12, %v1097_v55, %v1094_v58  ;;  %v2203_v15 = vpop.eup %2202  ;;  %v385_v53 = vmul.f32 1.442695, %v333_v35  ;;  %vm3518_vm14 = vcmp.lt.f32.partialorder %v577_v37, 0.0004427343 }
 0x12b   : > { %v1422_v16 = vsub.f32 0.0, %v1390_v7  ;;  %v1260_v17 = vadd.f32 %v1100_v10, %v812_v14  ;;  %v1606_v28 = vmul.f32 0.6931472, %v2203_v15  ;;  %v584_v29 = vadd.f32 1.0, %v583_v5  ;;  %v2205_v12 = vpop.eup %2204  ;;  %v171_v58 = vld [vmem:[%s2668_s17 + $0xb0] sm:$0xff] }
 0x12c   : > { %v1423_v47 = vsub.f32 0.0, %v1391_v3  ;;  %v576_v34 = vmul.f32 %v3459_v52, %v575_v54  ;;  %v586_v51 = vand.u32 2147483647, %v3480_v31  ;;  %v573_v35 = vmul.f32 0.6931472, %v2205_v12 }
 0x12d   : > { %v1467_v21 = vmul.f32 1.442695, %v1422_v16  ;;  %v1294_v13 = vmul.f32 %v2743_v46, %v1260_v17  ;;  %v2207_v44 = vpop.eup %2206  ;;  %v1612_v38 = vsel %vm3512_vm13, %v1609_v25, %v1606_v28  ;;  %2214 = vpow2.f32 %v385_v53  ;;  %v172_v25 = vld [vmem:[%s2668_s17 + $0xb8] sm:$0xff] }
 0x12e   : > { %v1469_v14 = vmul.f32 1.442695, %v1423_v47  ;;  %v1804_v0 = vadd.f32 %v1612_v38, %v1356_v30  ;;  %v1101_v57 = vadd.f32 1.0, %v2207_v44  ;;  %v1357_v52 = vmax.f32 %v3464_v39, 0.0 }
 0x12f   : > { %2216 = vpow2.f32 %v1467_v21  ;;  %v3530_v41 = vadd.f32 %v2752_v56, %v1294_v13  ;;  %v2209_v18 = vpop.eup %2208  ;;  %v1104_v4 = vmul.f32 -0.5, %v2207_v44  ;;  %v814_v20 = vmax.f32 %v3471_v61, 0.0 }
 0x130   : > { %2218 = vpow2.f32 %v1469_v14  ;;  %v2211_v55 = vpop.eup %2210  ;;  %1836 = vst [vmem:[%s3139_s19 + $0x58] sm:$0xff] %v1804_v0  ;;  %v1613_v49 = vadd.f32 1.0, %v2209_v18  ;;  %v1616_v27 = vmul.f32 -0.5, %v2209_v18  ;;  %v1358_v23 = vmax.f32 %v3498_v60, 0.0 }
 0x131   : > { %v585_v30 = vmul.f32 %v3480_v31, %v584_v29  ;;  %v1392_v59 = vand.u32 2147483647, %v3530_v41  ;;  %2220 = vlog2.f32 %v1101_v57  ;;  %v579_v22 = vsel %vm3518_vm14, %v576_v34, %v573_v35 }
 0x132   : > { %v2213_v63 = vpop.eup %2212  ;;  %vm3540_vm15 = vcmp.lt.f32.partialorder %v586_v51, 0.0004427343  ;;  %2222 = vlog2.f32 %v1613_v49  ;;  %v1107_v48 = vand.u32 2147483647, %v2207_v44  ;;  %v3545_v37 = vadd.f32 %v2677_v2, %v204_v32 }
 0x133   : > { %v1110_v9 = vadd.f32 1.0, %v2213_v63  ;;  %v1619_v5 = vand.u32 2147483647, %v2209_v18  ;;  %v1424_v31 = vsub.f32 0.0, %v1392_v59  ;;  %v1105_v7 = vadd.f32 1.0, %v1104_v4 }
 0x134   : > { %v1113_v54 = vmul.f32 -0.5, %v2213_v63  ;;  %v1617_v3 = vadd.f32 1.0, %v1616_v27  ;;  %v715_v10 = vadd.f32 %v579_v22, %v267_v40  ;;  %v582_v15 = vmul.f32 0.6931472, %v2211_v55 }
 0x135   : > { %2224 = vlog2.f32 %v1110_v9  ;;  %v1359_v26 = vmax.f32 %v3502_v45, 0.0  ;;  %v1471_v16 = vmul.f32 1.442695, %v1424_v31  ;;  %v1116_v17 = vand.u32 2147483647, %v2213_v63 }
 0x136   : > { %v205_v53 = vmul.f32 %v2675_v1, %v171_v58  ;;  %vm3553_vm0 = vcmp.lt.f32.partialorder %v1107_v48, 0.0004427343  ;;  %v749_v28 = vmul.f32 %v2732_v36, %v715_v10  ;;  %v588_v47 = vsel %vm3540_vm15, %v585_v30, %v582_v15 }
 0x137   : > { %v206_v43 = vmul.f32 %v2675_v1, %v172_v25  ;;  %v3561_v11 = vpop.eup %2214  ;;  %vm3563_vm1 = vcmp.lt.f32.partialorder %v1619_v5, 0.0004427343  ;;  %2226 = vpow2.f32 %v1471_v16  ;;  %v1114_v29 = vadd.f32 1.0, %v1113_v54 }
 0x138   : > { %v716_v12 = vadd.f32 %v588_v47, %v268_v50  ;;  %v1618_v13 = vmul.f32 %v2209_v18, %v1617_v3  ;;  %v1106_v34 = vmul.f32 %v2207_v44, %v1105_v7  ;;  %v3570_v51 = vadd.f32 %v2737_v42, %v749_v28 }
 0x139   : > { %v2217_v21 = vpop.eup %2216  ;;  %v302_v38 = vand.u32 2147483647, %v3545_v37  ;;  %vm3573_vm2 = vcmp.lt.f32.partialorder %v1116_v17, 0.0004427343  ;;  %v3579_v4 = vadd.f32 %v2677_v2, %v205_v53  ;;  %v589_v44 = vadd.f32 1.0, %v3561_v11 }
 0x13a   : > { %v2219_v14 = vpop.eup %2218  ;;  %v1622_v35 = vadd.f32 1.0, %v2217_v21  ;;  %v750_v57 = vmul.f32 %v2732_v36, %v716_v12  ;;  %v1625_v8 = vmul.f32 -0.5, %v2217_v21  ;;  %v3583_v18 = vadd.f32 %v2677_v2, %v206_v43 }
 0x13b   : > { %v1631_v50 = vadd.f32 1.0, %v2219_v14  ;;  %v2221_v55 = vpop.eup %2220  ;;  %v1115_v49 = vmul.f32 %v2213_v63, %v1114_v29  ;;  %v847_v27 = vand.u32 2147483647, %v3570_v51  ;;  %v592_v30 = vmul.f32 -0.5, %v3561_v11 }
 0x13c   : > { %2228 = vlog2.f32 %v1622_v35  ;;  %v2223_v59 = vpop.eup %2222  ;;  %v1634_v22 = vmul.f32 -0.5, %v2219_v14  ;;  %v1103_v19 = vmul.f32 0.6931472, %v2221_v55  ;;  %v334_v48 = vsub.f32 0.0, %v302_v38 }
 0x13d   : > { %2230 = vlog2.f32 %v1631_v50  ;;  %v1615_v9 = vmul.f32 0.6931472, %v2223_v59  ;;  %v1628_v58 = vand.u32 2147483647, %v2217_v21  ;;  %v879_v5 = vsub.f32 0.0, %v847_v27 }
 0x13e   : > { %v3588_v31 = vadd.f32 %v2737_v42, %v750_v57  ;;  %v1626_v54 = vadd.f32 1.0, %v1625_v8  ;;  %v1637_v25 = vand.u32 2147483647, %v2219_v14  ;;  %v1109_v63 = vsel %vm3553_vm0, %v1106_v34, %v1103_v19 }
 0x13f   : > { %v2225_v7 = vpop.eup %2224  ;;  %2232 = vlog2.f32 %v589_v44  ;;  %v1621_v3 = vsel %vm3563_vm1, %v1618_v13, %v1615_v9  ;;  %v1261_v10 = vadd.f32 %v1109_v63, %v813_v62  ;;  %v929_v16 = vmul.f32 1.442695, %v879_v5 }
 0x140   : > { %v1112_v15 = vmul.f32 0.6931472, %v2225_v7  ;;  %v1805_v17 = vadd.f32 %v1621_v3, %v1357_v52  ;;  %v1635_v53 = vadd.f32 1.0, %v1634_v22  ;;  %v848_v28 = vand.u32 2147483647, %v3588_v31 }
 0x141   : > { %v595_v47 = vand.u32 2147483647, %v3561_v11  ;;  %v2227_v32 = vpop.eup %2226  ;;  %v1295_v43 = vmul.f32 %v2743_v46, %v1261_v10  ;;  %2234 = vpow2.f32 %v929_v16  ;;  %v593_v29 = vadd.f32 1.0, %v592_v30 }
 0x142   : > { %v1118_v40 = vsel %vm3573_vm2, %v1115_v49, %v1112_v15  ;;  %1837 = vst [vmem:[%s3139_s19 + $0x60] sm:$0xff] %v1805_v17  ;;  %vm3604_vm3 = vcmp.lt.f32.partialorder %v1628_v58, 0.0004427343  ;;  %vm3608_vm4 = vcmp.lt.f32.partialorder %v1637_v25, 0.0004427343  ;;  %v1640_v62 = vadd.f32 1.0, %v2227_v32 }
 0x143   : > { %v1262_v52 = vadd.f32 %v1118_v40, %v814_v20  ;;  %v1627_v12 = vmul.f32 %v2217_v21, %v1626_v54  ;;  %v3615_v13 = vadd.f32 %v2752_v56, %v1295_v43  ;;  %v880_v34 = vsub.f32 0.0, %v848_v28  ;;  %v173_v15 = vld [vmem:[%s2668_s17 + $0xc0] sm:$0xff]  ;;  %v174_v40 = vld [vmem:[%s2668_s17 + $0xc8] sm:$0xff] }
 0x144   : > { %v387_v38 = vmul.f32 1.442695, %v334_v48  ;;  %v1636_v35 = vmul.f32 %v2219_v14, %v1635_v53  ;;  %2236 = vlog2.f32 %v1640_v62  ;;  %v1643_v0 = vmul.f32 -0.5, %v2227_v32 }
 0x145   : > { %v1296_v57 = vmul.f32 %v2743_v46, %v1262_v52  ;;  %v1393_v50 = vand.u32 2147483647, %v3615_v13  ;;  %v931_v44 = vmul.f32 1.442695, %v880_v34  ;;  %v594_v55 = vmul.f32 %v3561_v11, %v593_v29 }
 0x146   : > { %v2229_v8 = vpop.eup %2228  ;;  %2238 = vpow2.f32 %v387_v38  ;;  %vm3623_vm5 = vcmp.lt.f32.partialorder %v595_v47, 0.0004427343  ;;  %v303_v14 = vand.u32 2147483647, %v3579_v4  ;;  %v1646_v30 = vand.u32 2147483647, %v2227_v32 }
 0x147   : > { %v2231_v61 = vpop.eup %2230  ;;  %v1624_v20 = vmul.f32 0.6931472, %v2229_v8  ;;  %v3621_v21 = vadd.f32 %v2752_v56, %v1296_v57  ;;  %v1425_v59 = vsub.f32 0.0, %v1393_v50  ;;  %2240 = vpow2.f32 %v931_v44 }
 0x148   : > { %v1633_v27 = vmul.f32 0.6931472, %v2231_v61  ;;  %v1644_v19 = vadd.f32 1.0, %v1643_v0  ;;  %v335_v9 = vsub.f32 0.0, %v303_v14  ;;  %v304_v10 = vand.u32 2147483647, %v3583_v18 }
 0x149   : > { %v2233_v22 = vpop.eup %2232  ;;  %v1630_v11 = vsel %vm3604_vm3, %v1627_v12, %v1624_v20  ;;  %v1394_v48 = vand.u32 2147483647, %v3621_v21  ;;  %v1473_v7 = vmul.f32 1.442695, %v1425_v59  ;;  %v1360_v17 = vmax.f32 %v3530_v41, 0.0 }
 0x14a   : > { %v1806_v58 = vadd.f32 %v1630_v11, %v1358_v23  ;;  %v1639_v5 = vsel %vm3608_vm4, %v1636_v35, %v1633_v27  ;;  %v591_v54 = vmul.f32 0.6931472, %v2233_v22  ;;  %v389_v3 = vmul.f32 1.442695, %v335_v9 }
 0x14b   : > { %v1807_v25 = vadd.f32 %v1639_v5, %v1359_v26  ;;  %v1426_v63 = vsub.f32 0.0, %v1394_v48  ;;  %v2235_v16 = vpop.eup %2234  ;;  %2242 = vpow2.f32 %v1473_v7  ;;  %v270_v23 = vmax.f32 %v3545_v37, 0.0 }
 0x14c   : > { %1838 = vst [vmem:[%s3139_s19 + $0x68] sm:$0xff] %v1806_v58  ;;  %v597_v60 = vsel %vm3623_vm5, %v594_v55, %v591_v54  ;;  %v1645_v53 = vmul.f32 %v2227_v32, %v1644_v19  ;;  %v1119_v26 = vadd.f32 1.0, %v2235_v16  ;;  %2244 = vpow2.f32 %v389_v3 }
 0x14d   : > { %1839 = vst [vmem:[%s3139_s19 + $0x70] sm:$0xff] %v1807_v25  ;;  %v1475_v45 = vmul.f32 1.442695, %v1426_v63  ;;  %v717_v28 = vadd.f32 %v597_v60, %v269_v24  ;;  %v336_v47 = vsub.f32 0.0, %v304_v10  ;;  %v207_v43 = vmul.f32 %v2675_v1, %v173_v15 }
 0x14e   : > { %v2237_v29 = vpop.eup %2236  ;;  %vm3649_vm6 = vcmp.lt.f32.partialorder %v1646_v30, 0.0004427343  ;;  %v815_v39 = vmax.f32 %v3570_v51, 0.0  ;;  %v1122_v41 = vmul.f32 -0.5, %v2235_v16  ;;  %v1125_v52 = vand.u32 2147483647, %v2235_v16 }
 0x14f   : > { %2246 = vpow2.f32 %v1475_v45  ;;  %v1642_v62 = vmul.f32 0.6931472, %v2237_v29  ;;  %v751_v6 = vmul.f32 %v2732_v36, %v717_v28  ;;  %v391_v24 = vmul.f32 1.442695, %v336_v47 }
 0x150   : > { %v2239_v32 = vpop.eup %2238  ;;  %2248 = vlog2.f32 %v1119_v26  ;;  %v816_v12 = vmax.f32 %v3588_v31, 0.0  ;;  %v208_v38 = vmul.f32 %v2675_v1, %v174_v40  ;;  %v3663_v8 = vadd.f32 %v2677_v2, %v207_v43 }
 0x151   : > { %v598_v34 = vadd.f32 1.0, %v2239_v32  ;;  %v2241_v35 = vpop.eup %2240  ;;  %v1648_v0 = vsel %vm3649_vm6, %v1645_v53, %v1642_v62  ;;  %v3660_v57 = vadd.f32 %v2737_v42, %v751_v6  ;;  %2250 = vpow2.f32 %v391_v24 }
 0x152   : > { %v1808_v50 = vadd.f32 %v1648_v0, %v1360_v17  ;;  %v1128_v44 = vadd.f32 1.0, %v2241_v35  ;;  %v1131_v55 = vmul.f32 -0.5, %v2241_v35  ;;  %v601_v61 = vmul.f32 -0.5, %v2239_v32 }
 0x153   : > { %v1123_v20 = vadd.f32 1.0, %v1122_v41  ;;  %v1134_v49 = vand.u32 2147483647, %v2241_v35  ;;  %v849_v14 = vand.u32 2147483647, %v3660_v57  ;;  %2252 = vlog2.f32 %v598_v34 }
 0x154   : > { %1840 = vst [vmem:[%s3139_s19 + $0x78] sm:$0xff] %v1808_v50  ;;  %v1361_v27 = vmax.f32 %v3615_v13, 0.0  ;;  %2254 = vlog2.f32 %v1128_v44  ;;  %v604_v30 = vand.u32 2147483647, %v2239_v32  ;;  %v271_v59 = vmax.f32 %v3579_v4, 0.0 }
 0x155   : > { %v2243_v22 = vpop.eup %2242  ;;  %v1362_v11 = vmax.f32 %v3621_v21, 0.0  ;;  %vm3670_vm7 = vcmp.lt.f32.partialorder %v1125_v52, 0.0004427343  ;;  %v881_v48 = vsub.f32 0.0, %v849_v14  ;;  %v3675_v9 = vadd.f32 %v2677_v2, %v208_v38 }
 0x156   : > { %v1649_v58 = vadd.f32 1.0, %v2243_v22  ;;  %v1652_v5 = vmul.f32 -0.5, %v2243_v22  ;;  %v1132_v7 = vadd.f32 1.0, %v1131_v55  ;;  %v602_v54 = vadd.f32 1.0, %v601_v61  ;;  %v2245_v25 = vpop.eup %2244 }
 0x157   : > { %v1124_v63 = vmul.f32 %v2235_v16, %v1123_v20  ;;  %vm3677_vm8 = vcmp.lt.f32.partialorder %v1134_v49, 0.0004427343  ;;  %v933_v10 = vmul.f32 1.442695, %v881_v48  ;;  %v305_v15 = vand.u32 2147483647, %v3663_v8 }
 0x158   : > { %2256 = vlog2.f32 %v1649_v58  ;;  %v1655_v17 = vand.u32 2147483647, %v2243_v22  ;;  %vm3682_vm9 = vcmp.lt.f32.partialorder %v604_v30, 0.0004427343  ;;  %v607_v45 = vadd.f32 1.0, %v2245_v25 }
 0x159   : > { %v2247_v60 = vpop.eup %2246  ;;  %v1653_v28 = vadd.f32 1.0, %v1652_v5  ;;  %2258 = vpow2.f32 %v933_v10  ;;  %v603_v40 = vmul.f32 %v2239_v32, %v602_v54  ;;  %v610_v29 = vmul.f32 -0.5, %v2245_v25 }
 0x15a   : > { %v2249_v26 = vpop.eup %2248  ;;  %v1658_v47 = vadd.f32 1.0, %v2247_v60  ;;  %v1661_v16 = vmul.f32 -0.5, %v2247_v60  ;;  %2260 = vlog2.f32 %v607_v45  ;;  %v1664_v62 = vand.u32 2147483647, %v2247_v60 }
 0x15b   : > { %v1121_v43 = vmul.f32 0.6931472, %v2249_v26  ;;  %v3687_v41 = vpop.eup %2250  ;;  %v1133_v6 = vmul.f32 %v2241_v35, %v1132_v7  ;;  %v337_v24 = vsub.f32 0.0, %v305_v15  ;;  %v306_v0 = vand.u32 2147483647, %v3675_v9 }
 0x15c   : > { %2262 = vlog2.f32 %v1658_v47  ;;  %v1662_v52 = vadd.f32 1.0, %v1661_v16  ;;  %v616_v38 = vadd.f32 1.0, %v3687_v41  ;;  %v1654_v44 = vmul.f32 %v2243_v22, %v1653_v28 }
 0x15d   : > { %v1127_v34 = vsel %vm3670_vm7, %v1124_v63, %v1121_v43  ;;  %v2253_v50 = vpop.eup %2252  ;;  %vm3693_vm10 = vcmp.lt.f32.partialorder %v1655_v17, 0.0004427343  ;;  %v209_v35 = vmul.f32 %v2675_v1, %v175_v33  ;;  %v611_v49 = vadd.f32 1.0, %v610_v29 }
 0x15e   : > { %v1263_v55 = vadd.f32 %v1127_v34, %v815_v39  ;;  %v2255_v61 = vpop.eup %2254  ;;  %v600_v20 = vmul.f32 0.6931472, %v2253_v50  ;;  %v613_v14 = vand.u32 2147483647, %v2245_v25  ;;  %2264 = vlog2.f32 %v616_v38 }
 0x15f   : > { %vm3700_vm11 = vcmp.lt.f32.partialorder %v1664_v62, 0.0004427343  ;;  %v1130_v19 = vmul.f32 0.6931472, %v2255_v61  ;;  %v393_v48 = vmul.f32 1.442695, %v337_v24  ;;  %v1663_v58 = vmul.f32 %v2247_v60, %v1662_v52 }
 0x160   : > { %v1297_v22 = vmul.f32 %v2743_v46, %v1263_v55  ;;  %v606_v51 = vsel %vm3682_vm9, %v603_v40, %v600_v20  ;;  %v619_v39 = vmul.f32 -0.5, %v3687_v41  ;;  %v338_v5 = vsub.f32 0.0, %v306_v0 }
 0x161   : > { %v1136_v54 = vsel %vm3677_vm8, %v1133_v6, %v1130_v19  ;;  %v718_v63 = vadd.f32 %v606_v51, %v270_v23  ;;  %2266 = vpow2.f32 %v393_v48  ;;  %v612_v60 = vmul.f32 %v2245_v25, %v611_v49  ;;  %v176_v51 = vld [vmem:[%s2668_s17 + $0xd8] sm:$0xff] }
 0x162   : > { %v3709_v7 = vadd.f32 %v2752_v56, %v1297_v22  ;;  %v2257_v10 = vpop.eup %2256  ;;  %v1264_v15 = vadd.f32 %v1136_v54, %v816_v12  ;;  %vm3717_vm12 = vcmp.lt.f32.partialorder %v613_v14, 0.0004427343  ;;  %v622_v53 = vand.u32 2147483647, %v3687_v41 }
 0x163   : > { %v2259_v45 = vpop.eup %2258  ;;  %v1651_v26 = vmul.f32 0.6931472, %v2257_v10  ;;  %v752_v28 = vmul.f32 %v2732_v36, %v718_v63  ;;  %v3725_v37 = vadd.f32 %v2677_v2, %v209_v35  ;;  %v620_v25 = vadd.f32 1.0, %v619_v39 }
 0x164   : > { %v1395_v3 = vand.u32 2147483647, %v3709_v7  ;;  %v2261_v23 = vpop.eup %2260  ;;  %v1298_v31 = vmul.f32 %v2743_v46, %v1264_v15  ;;  %v1137_v12 = vadd.f32 1.0, %v2259_v45  ;;  %v395_v47 = vmul.f32 1.442695, %v338_v5 }
 0x165   : > { %v1657_v43 = vsel %vm3693_vm10, %v1654_v44, %v1651_v26  ;;  %v3731_v29 = vadd.f32 %v2737_v42, %v752_v28  ;;  %v609_v33 = vmul.f32 0.6931472, %v2261_v23  ;;  %v1140_v34 = vmul.f32 -0.5, %v2259_v45 }
 0x166   : > { %v2263_v16 = vpop.eup %2262  ;;  %v1427_v40 = vsub.f32 0.0, %v1395_v3  ;;  %v1809_v62 = vadd.f32 %v1657_v43, %v1361_v27  ;;  %v3736_v24 = vadd.f32 %v2752_v56, %v1298_v31  ;;  %2268 = vlog2.f32 %v1137_v12  ;;  %v177_v31 = vld [vmem:[%s2668_s17 + $0xe0] sm:$0xff] }
 0x167   : > { %v1660_v6 = vmul.f32 0.6931472, %v2263_v16  ;;  %v272_v38 = vmax.f32 %v3583_v18, 0.0  ;;  %v307_v0 = vand.u32 2147483647, %v3725_v37  ;;  %v621_v32 = vmul.f32 %v3687_v41, %v620_v25 }
 0x168   : > { %v1477_v52 = vmul.f32 1.442695, %v1427_v40  ;;  %v2265_v50 = vpop.eup %2264  ;;  %1841 = vst [vmem:[%s3139_s19 + $0x80] sm:$0xff] %v1809_v62  ;;  %v1396_v13 = vand.u32 2147483647, %v3736_v24  ;;  %v615_v18 = vsel %vm3717_vm12, %v612_v60, %v609_v33  ;;  %v1141_v41 = vadd.f32 1.0, %v1140_v34 }
 0x169   : > { %v1666_v44 = vsel %vm3700_vm11, %v1663_v58, %v1660_v6  ;;  %v850_v27 = vand.u32 2147483647, %v3731_v29  ;;  %vm3750_vm13 = vcmp.lt.f32.partialorder %v622_v53, 0.0004427343  ;;  %v719_v49 = vadd.f32 %v615_v18, %v271_v59 }
 0x16a   : > { %v1810_v55 = vadd.f32 %v1666_v44, %v1362_v11  ;;  %2270 = vpow2.f32 %v1477_v52  ;;  %v1428_v61 = vsub.f32 0.0, %v1396_v13  ;;  %v618_v14 = vmul.f32 0.6931472, %v2265_v50 }
 0x16b   : > { %v882_v20 = vsub.f32 0.0, %v850_v27  ;;  %v2267_v30 = vpop.eup %2266  ;;  %v1143_v21 = vand.u32 2147483647, %v2259_v45  ;;  %2272 = vpow2.f32 %v395_v47  ;;  %v339_v11 = vsub.f32 0.0, %v307_v0 }
 0x16c   : > { %1842 = vst [vmem:[%s3139_s19 + $0x88] sm:$0xff] %v1810_v55  ;;  %v1479_v22 = vmul.f32 1.442695, %v1428_v61  ;;  %v753_v48 = vmul.f32 %v2732_v36, %v719_v49  ;;  %v624_v58 = vsel %vm3750_vm13, %v621_v32, %v618_v14  ;;  %v273_v5 = vmax.f32 %v3663_v8, 0.0  ;;  %v178_v49 = vld [vmem:[%s2668_s17 + $0xe8] sm:$0xff] }
 0x16d   : > { %v935_v19 = vmul.f32 1.442695, %v882_v20  ;;  %v720_v39 = vadd.f32 %v624_v58, %v272_v38  ;;  %v625_v4 = vadd.f32 1.0, %v2267_v30  ;;  %v817_v59 = vmax.f32 %v3660_v57, 0.0 }
 0x16e   : > { %2274 = vpow2.f32 %v1479_v22  ;;  %v3764_v54 = vadd.f32 %v2737_v42, %v753_v48  ;;  %v397_v63 = vmul.f32 1.442695, %v339_v11  ;;  %v1142_v10 = vmul.f32 %v2259_v45, %v1141_v41 }
 0x16f   : > { %2276 = vpow2.f32 %v935_v19  ;;  %v754_v15 = vmul.f32 %v2732_v36, %v720_v39  ;;  %v210_v60 = vmul.f32 %v2675_v1, %v176_v51  ;;  %vm3768_vm14 = vcmp.lt.f32.partialorder %v1143_v21, 0.0004427343 }
 0x170   : > { %v2269_v17 = vpop.eup %2268  ;;  %v851_v26 = vand.u32 2147483647, %v3764_v54  ;;  %2278 = vlog2.f32 %v625_v4  ;;  %v628_v57 = vmul.f32 -0.5, %v2267_v30  ;;  %v274_v45 = vmax.f32 %v3675_v9, 0.0 }
 0x171   : > { %v1139_v3 = vmul.f32 0.6931472, %v2269_v17  ;;  %v3774_v28 = vadd.f32 %v2737_v42, %v754_v15  ;;  %v275_v23 = vmax.f32 %v3725_v37, 0.0  ;;  %v1363_v12 = vmax.f32 %v3709_v7, 0.0 }
 0x172   : > { %v883_v25 = vsub.f32 0.0, %v851_v26  ;;  %v631_v47 = vand.u32 2147483647, %v2267_v30  ;;  %2280 = vpow2.f32 %v397_v63  ;;  %v818_v40 = vmax.f32 %v3731_v29, 0.0 }
 0x173   : > { %v1145_v43 = vsel %vm3768_vm14, %v1142_v10, %v1139_v3  ;;  %v852_v33 = vand.u32 2147483647, %v3774_v28  ;;  %v3785_v62 = vadd.f32 %v2677_v2, %v210_v60  ;;  %v629_v34 = vadd.f32 1.0, %v628_v57 }
 0x174   : > { %v2271_v16 = vpop.eup %2270  ;;  %v1265_v52 = vadd.f32 %v1145_v43, %v817_v59  ;;  %v211_v38 = vmul.f32 %v2675_v1, %v177_v31  ;;  %v1364_v44 = vmax.f32 %v3736_v24, 0.0  ;;  %v937_v13 = vmul.f32 1.442695, %v883_v25 }
 0x175   : > { %v1667_v6 = vadd.f32 1.0, %v2271_v16  ;;  %v3788_v0 = vpop.eup %2272  ;;  %v1670_v50 = vmul.f32 -0.5, %v2271_v16  ;;  %v884_v27 = vsub.f32 0.0, %v852_v33  ;;  %v819_v55 = vmax.f32 %v3764_v54, 0.0 }
 0x176   : > { %v1299_v32 = vmul.f32 %v2743_v46, %v1265_v52  ;;  %vm3793_vm15 = vcmp.lt.f32.partialorder %v631_v47, 0.0004427343  ;;  %v276_v61 = vmax.f32 %v3785_v62, 0.0  ;;  %v308_v20 = vand.u32 2147483647, %v3785_v62 }
 0x177   : > { %2282 = vlog2.f32 %v1667_v6  ;;  %v939_v35 = vmul.f32 1.442695, %v884_v27  ;;  %v1673_v41 = vand.u32 2147483647, %v2271_v16  ;;  %v630_v11 = vmul.f32 %v2267_v30, %v629_v34 }
 0x178   : > { %2284 = vpow2.f32 %v937_v13  ;;  %v2275_v14 = vpop.eup %2274  ;;  %v3801_v21 = vadd.f32 %v2752_v56, %v1299_v32  ;;  %v3804_v22 = vadd.f32 %v2677_v2, %v211_v38  ;;  %v1671_v48 = vadd.f32 1.0, %v1670_v50 }
 0x179   : > { %v2277_v19 = vpop.eup %2276  ;;  %v1676_v58 = vadd.f32 1.0, %v2275_v14  ;;  %2286 = vpow2.f32 %v939_v35  ;;  %v634_v51 = vadd.f32 1.0, %v3788_v0  ;;  %v1679_v4 = vmul.f32 -0.5, %v2275_v14 }
 0x17a   : > { %v2279_v39 = vpop.eup %2278  ;;  %v1397_v59 = vand.u32 2147483647, %v3801_v21  ;;  %v1146_v63 = vadd.f32 1.0, %v2277_v19  ;;  %v212_v10 = vmul.f32 %v2675_v1, %v178_v49  ;;  %v1149_v15 = vmul.f32 -0.5, %v2277_v19 }
 0x17b   : > { %2288 = vlog2.f32 %v1676_v58  ;;  %v637_v30 = vmul.f32 -0.5, %v3788_v0  ;;  %v340_v60 = vsub.f32 0.0, %v308_v20  ;;  %v1682_v53 = vand.u32 2147483647, %v2275_v14 }
 0x17c   : > { %v3810_v17 = vpop.eup %2280  ;;  %v1429_v26 = vsub.f32 0.0, %v1397_v59  ;;  %2290 = vlog2.f32 %v1146_v63  ;;  %v627_v57 = vmul.f32 0.6931472, %v2279_v39  ;;  %v1672_v3 = vmul.f32 %v2271_v16, %v1671_v48 }
 0x17d   : > { %vm3812_vm0 = vcmp.lt.f32.partialorder %v1673_v41, 0.0004427343  ;;  %v820_v25 = vmax.f32 %v3774_v28, 0.0  ;;  %2292 = vlog2.f32 %v634_v51  ;;  %v1680_v47 = vadd.f32 1.0, %v1679_v4 }
 0x17e   : > { %v1481_v43 = vmul.f32 1.442695, %v1429_v26  ;;  %v1152_v33 = vand.u32 2147483647, %v2277_v19  ;;  %v633_v6 = vsel %vm3793_vm15, %v630_v11, %v627_v57  ;;  %v1150_v52 = vadd.f32 1.0, %v1149_v15 }
 0x17f   : > { %v721_v34 = vadd.f32 %v633_v6, %v273_v5  ;;  %v643_v38 = vadd.f32 1.0, %v3810_v17  ;;  %v399_v16 = vmul.f32 1.442695, %v340_v60  ;;  %vm3822_vm1 = vcmp.lt.f32.partialorder %v1682_v53, 0.0004427343 }
 0x180   : > { %2294 = vpow2.f32 %v1481_v43  ;;  %v638_v27 = vadd.f32 1.0, %v637_v30  ;;  %v640_v32 = vand.u32 2147483647, %v3788_v0  ;;  %v646_v8 = vmul.f32 -0.5, %v3810_v17 }
 0x181   : > { %v2283_v50 = vpop.eup %2282  ;;  %v755_v20 = vmul.f32 %v2732_v36, %v721_v34  ;;  %2296 = vlog2.f32 %v643_v38  ;;  %v1681_v5 = vmul.f32 %v2275_v14, %v1680_v47  ;;  %vm3831_vm2 = vcmp.lt.f32.partialorder %v1152_v33, 0.0004427343 }
 0x182   : > { %v3827_v35 = vpop.eup %2284  ;;  %v1669_v18 = vmul.f32 0.6931472, %v2283_v50  ;;  %v309_v11 = vand.u32 2147483647, %v3804_v22  ;;  %v1151_v51 = vmul.f32 %v2277_v19, %v1150_v52  ;;  %2298 = vpow2.f32 %v399_v16 }
 0x183   : > { %v1155_v41 = vadd.f32 1.0, %v3827_v35  ;;  %v3837_v48 = vpop.eup %2286  ;;  %v3842_v39 = vadd.f32 %v2737_v42, %v755_v20  ;;  %v639_v4 = vmul.f32 %v3788_v0, %v638_v27  ;;  %vm3847_vm3 = vcmp.lt.f32.partialorder %v640_v32, 0.0004427343 }
 0x184   : > { %v1675_v58 = vsel %vm3812_vm0, %v1672_v3, %v1669_v18  ;;  %v1158_v15 = vmul.f32 -0.5, %v3827_v35  ;;  %v1164_v30 = vadd.f32 1.0, %v3837_v48  ;;  %v647_v19 = vadd.f32 1.0, %v646_v8 }
 0x185   : > { %v1811_v14 = vadd.f32 %v1675_v58, %v1363_v12  ;;  %2300 = vlog2.f32 %v1155_v41  ;;  %v2289_v63 = vpop.eup %2288  ;;  %v649_v60 = vand.u32 2147483647, %v3810_v17  ;;  %v853_v7 = vand.u32 2147483647, %v3842_v39 }
 0x186   : > { %v2291_v53 = vpop.eup %2290  ;;  %v1678_v26 = vmul.f32 0.6931472, %v2289_v63  ;;  %v341_v12 = vsub.f32 0.0, %v309_v11  ;;  %v3857_v0 = vadd.f32 %v2677_v2, %v212_v10  ;;  %v1161_v31 = vand.u32 2147483647, %v3827_v35 }
 0x187   : > { %1843 = vst [vmem:[%s3139_s19 + $0x90] sm:$0xff] %v1811_v14  ;;  %v2293_v57 = vpop.eup %2292  ;;  %v1148_v3 = vmul.f32 0.6931472, %v2291_v53  ;;  %2302 = vlog2.f32 %v1164_v30  ;;  %v1167_v47 = vmul.f32 -0.5, %v3837_v48  ;;  %v885_v33 = vsub.f32 0.0, %v853_v7 }
 0x188   : > { %v1684_v43 = vsel %vm3822_vm1, %v1681_v5, %v1678_v26  ;;  %v636_v6 = vmul.f32 0.6931472, %v2293_v57  ;;  %v401_v52 = vmul.f32 1.442695, %v341_v12  ;;  %v1159_v38 = vadd.f32 1.0, %v1158_v15  ;;  %v179_v15 = vld [vmem:[%s2668_s17 + $0xf0] sm:$0xff] }
 0x189   : > { %v1812_v34 = vadd.f32 %v1684_v43, %v1364_v44  ;;  %v1154_v10 = vsel %vm3831_vm2, %v1151_v51, %v1148_v3  ;;  %v648_v16 = vmul.f32 %v3810_v17, %v647_v19  ;;  %v941_v32 = vmul.f32 1.442695, %v885_v33 }
 0x18a   : > { %v2295_v50 = vpop.eup %2294  ;;  %v1266_v27 = vadd.f32 %v1154_v10, %v818_v40  ;;  %v642_v13 = vsel %vm3847_vm3, %v639_v4, %v636_v6  ;;  %2304 = vpow2.f32 %v401_v52  ;;  %v1170_v24 = vand.u32 2147483647, %v3837_v48 }
 0x18b   : > { %v2297_v18 = vpop.eup %2296  ;;  %1844 = vst [vmem:[%s3139_s19 + $0x98] sm:$0xff] %v1812_v34  ;;  %v1685_v20 = vadd.f32 1.0, %v2295_v50  ;;  %v722_v44 = vadd.f32 %v642_v13, %v274_v45  ;;  %vm3876_vm4 = vcmp.lt.f32.partialorder %v649_v60, 0.0004427343  ;;  %v1168_v40 = vadd.f32 1.0, %v1167_v47 }
 0x18c   : > { %v1300_v29 = vmul.f32 %v2743_v46, %v1266_v27  ;;  %2306 = vpow2.f32 %v941_v32  ;;  %v645_v17 = vmul.f32 0.6931472, %v2297_v18  ;;  %v3881_v5 = vpop.eup %2298  ;;  %v1688_v49 = vmul.f32 -0.5, %v2295_v50 }
 0x18d   : > { %2308 = vlog2.f32 %v1685_v20  ;;  %v1160_v41 = vmul.f32 %v3827_v35, %v1159_v38  ;;  %v756_v11 = vmul.f32 %v2732_v36, %v722_v44  ;;  %vm3888_vm5 = vcmp.lt.f32.partialorder %v1161_v31, 0.0004427343 }
 0x18e   : > { %v3886_v45 = vadd.f32 %v2752_v56, %v1300_v29  ;;  %v651_v51 = vsel %vm3876_vm4, %v648_v16, %v645_v17  ;;  %v652_v14 = vadd.f32 1.0, %v3881_v5  ;;  %vm3895_vm6 = vcmp.lt.f32.partialorder %v1170_v24, 0.0004427343 }
 0x18f   : > { %v2301_v9 = vpop.eup %2300  ;;  %v3900_v35 = vadd.f32 %v2737_v42, %v756_v11  ;;  %v723_v63 = vadd.f32 %v651_v51, %v275_v23  ;;  %v1169_v19 = vmul.f32 %v3837_v48, %v1168_v40  ;;  %v655_v60 = vmul.f32 -0.5, %v3881_v5 }
 0x190   : > { %v1157_v4 = vmul.f32 0.6931472, %v2301_v9  ;;  %v1398_v30 = vand.u32 2147483647, %v3886_v45  ;;  %2310 = vlog2.f32 %v652_v14  ;;  %v1689_v26 = vadd.f32 1.0, %v1688_v49 }
 0x191   : > { %v2303_v53 = vpop.eup %2302  ;;  %v854_v12 = vand.u32 2147483647, %v3900_v35  ;;  %v757_v57 = vmul.f32 %v2732_v36, %v723_v63  ;;  %v213_v31 = vmul.f32 %v2675_v1, %v179_v15  ;;  %v1365_v48 = vmax.f32 %v3801_v21, 0.0 }
 0x192   : > { %v1163_v7 = vsel %vm3888_vm5, %v1160_v41, %v1157_v4  ;;  %v1430_v3 = vsub.f32 0.0, %v1398_v30  ;;  %v1166_v23 = vmul.f32 0.6931472, %v2303_v53  ;;  %v1691_v47 = vand.u32 2147483647, %v2295_v50 }
 0x193   : > { %v1267_v37 = vadd.f32 %v1163_v7, %v819_v55  ;;  %v886_v43 = vsub.f32 0.0, %v854_v12  ;;  %v3917_v33 = vadd.f32 %v2737_v42, %v757_v57  ;;  %v656_v54 = vadd.f32 1.0, %v655_v60 }
 0x194   : > { %v3919_v6 = vpop.eup %2304  ;;  %v1483_v52 = vmul.f32 1.442695, %v1430_v3  ;;  %v1172_v10 = vsel %vm3895_vm6, %v1169_v19, %v1166_v23  ;;  %v1690_v55 = vmul.f32 %v2295_v50, %v1689_v26  ;;  %v310_v21 = vand.u32 2147483647, %v3857_v0 }
 0x195   : > { %v1301_v34 = vmul.f32 %v2743_v46, %v1267_v37  ;;  %v1268_v38 = vadd.f32 %v1172_v10, %v820_v25  ;;  %v943_v16 = vmul.f32 1.442695, %v886_v43  ;;  %v855_v13 = vand.u32 2147483647, %v3917_v33  ;;  %v180_v43 = vld [vmem:[%s2668_s17 + $0xf8] sm:$0xff] }
 0x196   : > { %v2307_v27 = vpop.eup %2306  ;;  %2312 = vpow2.f32 %v1483_v52  ;;  %v661_v18 = vadd.f32 1.0, %v3919_v6  ;;  %vm3932_vm7 = vcmp.lt.f32.partialorder %v1691_v47, 0.0004427343  ;;  %v658_v50 = vand.u32 2147483647, %v3881_v5 }
 0x197   : > { %v3928_v32 = vadd.f32 %v2752_v56, %v1301_v34  ;;  %v2309_v20 = vpop.eup %2308  ;;  %v1302_v28 = vmul.f32 %v2743_v46, %v1268_v38  ;;  %v1173_v25 = vadd.f32 1.0, %v2307_v27  ;;  %2314 = vpow2.f32 %v943_v16 }
 0x198   : > { %v1687_v44 = vmul.f32 0.6931472, %v2309_v20  ;;  %v657_v29 = vmul.f32 %v3881_v5, %v656_v54  ;;  %v1176_v17 = vmul.f32 -0.5, %v2307_v27  ;;  %v3944_v49 = vadd.f32 %v2677_v2, %v213_v31 }
 0x199   : > { %v1399_v8 = vand.u32 2147483647, %v3928_v32  ;;  %v3941_v40 = vadd.f32 %v2752_v56, %v1302_v28  ;;  %2316 = vlog2.f32 %v1173_v25  ;;  %v887_v58 = vsub.f32 0.0, %v855_v13 }
 0x19a   : > { %v2311_v41 = vpop.eup %2310  ;;  %v1693_v11 = vsel %vm3932_vm7, %v1690_v55, %v1687_v44  ;;  %2318 = vlog2.f32 %v661_v18  ;;  %vm659_vm8 = vcmp.lt.f32.partialorder %v658_v50, 0.0004427343  ;;  %v342_v5 = vsub.f32 0.0, %v310_v21 }
 0x19b   : > { %v1431_v9 = vsub.f32 0.0, %v1399_v8  ;;  %v1813_v51 = vadd.f32 %v1693_v11, %v1365_v48  ;;  %v1400_v14 = vand.u32 2147483647, %v3941_v40  ;;  %v945_v59 = vmul.f32 1.442695, %v887_v58 }
 0x19c   : > { %v654_v63 = vmul.f32 0.6931472, %v2311_v41  ;;  %v664_v30 = vmul.f32 -0.5, %v3919_v6  ;;  %v1177_v19 = vadd.f32 1.0, %v1176_v17  ;;  %v311_v53 = vand.u32 2147483647, %v3944_v49 }
 0x19d   : > { %v1485_v4 = vmul.f32 1.442695, %v1431_v9  ;;  %1845 = vst [vmem:[%s3139_s19 + $0xa0] sm:$0xff] %v1813_v51  ;;  %v1432_v15 = vsub.f32 0.0, %v1400_v14  ;;  %v1179_v7 = vand.u32 2147483647, %v2307_v27 }
 0x19e   : > { %v660_v60 = vsel %vm659_vm8, %v657_v29, %v654_v63  ;;  %v277_v3 = vmax.f32 %v3804_v22, 0.0  ;;  %v403_v37 = vmul.f32 1.442695, %v342_v5  ;;  %v343_v23 = vsub.f32 0.0, %v311_v53 }
 0x19f   : > { %2320 = vpow2.f32 %v1485_v4  ;;  %v1487_v26 = vmul.f32 1.442695, %v1432_v15  ;;  %v724_v12 = vadd.f32 %v660_v60, %v276_v61  ;;  %v821_v48 = vmax.f32 %v3842_v39, 0.0 }
 0x1a0   : > { %2322 = vpow2.f32 %v945_v59  ;;  %v2313_v57 = vpop.eup %2312  ;;  %v665_v47 = vadd.f32 1.0, %v664_v30  ;;  %v1178_v10 = vmul.f32 %v2307_v27, %v1177_v19  ;;  %v667_v55 = vand.u32 2147483647, %v3919_v6 }
 0x1a1   : > { %v1694_v31 = vadd.f32 1.0, %v2313_v57  ;;  %2324 = vpow2.f32 %v1487_v26  ;;  %v2315_v52 = vpop.eup %2314  ;;  %v1697_v34 = vmul.f32 -0.5, %v2313_v57  ;;  %v758_v54 = vmul.f32 %v2732_v36, %v724_v12 }
 0x1a2   : > { %vm3959_vm9 = vcmp.lt.f32.partialorder %v1179_v7, 0.0004427343  ;;  %v1182_v22 = vadd.f32 1.0, %v2315_v52  ;;  %v405_v38 = vmul.f32 1.442695, %v343_v23  ;;  %v214_v27 = vmul.f32 %v2675_v1, %v180_v43 }
 0x1a3   : > { %v2317_v62 = vpop.eup %2316  ;;  %2326 = vlog2.f32 %v1694_v31  ;;  %v3964_v39 = vadd.f32 %v2737_v42, %v758_v54  ;;  %v1185_v13 = vmul.f32 -0.5, %v2315_v52  ;;  %v666_v20 = vmul.f32 %v3919_v6, %v665_v47 }
 0x1a4   : > { %v2319_v16 = vpop.eup %2318  ;;  %v1175_v21 = vmul.f32 0.6931472, %v2317_v62  ;;  %2328 = vpow2.f32 %v403_v37  ;;  %v1698_v24 = vadd.f32 1.0, %v1697_v34  ;;  %v1700_v28 = vand.u32 2147483647, %v2313_v57 }
 0x1a5   : > { %2330 = vlog2.f32 %v1182_v22  ;;  %v663_v18 = vmul.f32 0.6931472, %v2319_v16  ;;  %vm3970_vm10 = vcmp.lt.f32.partialorder %v667_v55, 0.0004427343  ;;  %v1366_v44 = vmax.f32 %v3886_v45, 0.0 }
 0x1a6   : > { %v1181_v25 = vsel %vm3959_vm9, %v1178_v10, %v1175_v21  ;;  %v856_v29 = vand.u32 2147483647, %v3964_v39  ;;  %2332 = vpow2.f32 %v405_v38  ;;  %v822_v17 = vmax.f32 %v3900_v35, 0.0 }
 0x1a7   : > { %v1269_v8 = vadd.f32 %v1181_v25, %v821_v48  ;;  %v1188_v41 = vand.u32 2147483647, %v2315_v52  ;;  %v823_v6 = vmax.f32 %v3917_v33, 0.0  ;;  %v3979_v11 = vadd.f32 %v2677_v2, %v214_v27 }
 0x1a8   : > { %v1186_v14 = vadd.f32 1.0, %v1185_v13  ;;  %v669_v45 = vsel %vm3970_vm10, %v666_v20, %v663_v18  ;;  %v1699_v5 = vmul.f32 %v2313_v57, %v1698_v24  ;;  %vm3984_vm11 = vcmp.lt.f32.partialorder %v1700_v28, 0.0004427343 }
 0x1a9   : > { %v2321_v1 = vpop.eup %2320  ;;  %v1303_v51 = vmul.f32 %v2743_v46, %v1269_v8  ;;  %v1367_v35 = vmax.f32 %v3928_v32, 0.0  ;;  %v888_v30 = vsub.f32 0.0, %v856_v29  ;;  %v725_v53 = vadd.f32 %v669_v45, %v277_v3 }
 0x1aa   : > { %v2323_v9 = vpop.eup %2322  ;;  %v1703_v58 = vadd.f32 1.0, %v2321_v1  ;;  %v1706_v2 = vmul.f32 -0.5, %v2321_v1  ;;  %v1187_v12 = vmul.f32 %v2315_v52, %v1186_v14  ;;  %vm3996_vm12 = vcmp.lt.f32.partialorder %v1188_v41, 0.0004427343 }
 0x1ab   : > { %v1191_v59 = vadd.f32 1.0, %v2323_v9  ;;  %v3989_v63 = vpop.eup %2324  ;;  %v3992_v15 = vadd.f32 %v2752_v56, %v1303_v51  ;;  %v1194_v60 = vmul.f32 -0.5, %v2323_v9  ;;  %v312_v37 = vand.u32 2147483647, %v3979_v11 }
 0x1ac   : > { %2334 = vlog2.f32 %v1703_v58  ;;  %v1712_v19 = vadd.f32 1.0, %v3989_v63  ;;  %v1709_v48 = vand.u32 2147483647, %v2321_v1  ;;  %v1197_v47 = vand.u32 2147483647, %v2323_v9 }
 0x1ad   : > { %2336 = vlog2.f32 %v1191_v59  ;;  %v2327_v26 = vpop.eup %2326  ;;  %v1401_v7 = vand.u32 2147483647, %v3992_v15  ;;  %v1707_v34 = vadd.f32 1.0, %v1706_v2  ;;  %v1715_v3 = vmul.f32 -0.5, %v3989_v63 }
 0x1ae   : > { %v4001_v23 = vpop.eup %2328  ;;  %v1696_v31 = vmul.f32 0.6931472, %v2327_v26  ;;  %2338 = vlog2.f32 %v1712_v19  ;;  %v947_v54 = vmul.f32 1.442695, %v888_v30  ;;  %v1195_v62 = vadd.f32 1.0, %v1194_v60 }
 0x1af   : > { %v2331_v43 = vpop.eup %2330  ;;  %v1433_v10 = vsub.f32 0.0, %v1401_v7  ;;  %v759_v61 = vmul.f32 %v2732_v36, %v725_v53  ;;  %v670_v21 = vadd.f32 1.0, %v4001_v23  ;;  %vm4010_vm13 = vcmp.lt.f32.partialorder %v1709_v48, 0.0004427343 }
 0x1b0   : > { %v1702_v52 = vsel %vm3984_vm11, %v1699_v5, %v1696_v31  ;;  %v1184_v55 = vmul.f32 0.6931472, %v2331_v43  ;;  %v4007_v22 = vpop.eup %2332  ;;  %2340 = vpow2.f32 %v947_v54  ;;  %v344_v20 = vsub.f32 0.0, %v312_v37 }
 0x1b1   : > { %v1814_v38 = vadd.f32 %v1702_v52, %v1366_v44  ;;  %v1489_v16 = vmul.f32 1.442695, %v1433_v10  ;;  %v4017_v18 = vadd.f32 %v2737_v42, %v759_v61  ;;  %v1716_v24 = vadd.f32 1.0, %v1715_v3 }
 0x1b2   : > { %v1190_v13 = vsel %vm3996_vm12, %v1187_v12, %v1184_v55  ;;  %v679_v25 = vadd.f32 1.0, %v4007_v22  ;;  %v1708_v50 = vmul.f32 %v2321_v1, %v1707_v34  ;;  %v1718_v44 = vand.u32 2147483647, %v3989_v63 }
 0x1b3   : > { %1846 = vst [vmem:[%s3139_s19 + $0xa8] sm:$0xff] %v1814_v38  ;;  %2342 = vpow2.f32 %v1489_v16  ;;  %v1270_v28 = vadd.f32 %v1190_v13, %v822_v17  ;;  %v857_v8 = vand.u32 2147483647, %v4017_v18  ;;  %v1196_v58 = vmul.f32 %v2323_v9, %v1195_v62 }
 0x1b4   : > { %2344 = vlog2.f32 %v670_v21  ;;  %vm4024_vm14 = vcmp.lt.f32.partialorder %v1197_v47, 0.0004427343  ;;  %v673_v5 = vmul.f32 -0.5, %v4001_v23  ;;  %v682_v1 = vmul.f32 -0.5, %v4007_v22 }
 0x1b5   : > { %v1304_v41 = vmul.f32 %v2743_v46, %v1270_v28  ;;  %2346 = vlog2.f32 %v679_v25  ;;  %v889_v17 = vsub.f32 0.0, %v857_v8  ;;  %v1717_v4 = vmul.f32 %v3989_v63, %v1716_v24 }
 0x1b6   : > { %v2335_v29 = vpop.eup %2334  ;;  %v407_v9 = vmul.f32 1.442695, %v344_v20  ;;  %v1368_v60 = vmax.f32 %v3941_v40, 0.0  ;;  %vm4037_vm15 = vcmp.lt.f32.partialorder %v1718_v44, 0.0004427343  ;;  %v674_v31 = vadd.f32 1.0, %v673_v5 }
 0x1b7   : > { %v2337_v14 = vpop.eup %2336  ;;  %v1705_v45 = vmul.f32 0.6931472, %v2335_v29  ;;  %v4032_v59 = vadd.f32 %v2752_v56, %v1304_v41  ;;  %v949_v26 = vmul.f32 1.442695, %v889_v17  ;;  %v676_v57 = vand.u32 2147483647, %v4001_v23 }
 0x1b8   : > { %v1193_v2 = vmul.f32 0.6931472, %v2337_v14  ;;  %v2339_v30 = vpop.eup %2338  ;;  %v683_v40 = vadd.f32 1.0, %v682_v1  ;;  %v685_v3 = vand.u32 2147483647, %v4007_v22  ;;  %v278_v55 = vmax.f32 %v3857_v0, 0.0 }
 0x1b9   : > { %v1711_v19 = vsel %vm4010_vm13, %v1708_v50, %v1705_v45  ;;  %v1714_v7 = vmul.f32 0.6931472, %v2339_v30  ;;  %v1402_v12 = vand.u32 2147483647, %v4032_v59  ;;  %2348 = vpow2.f32 %v949_v26 }
 0x1ba   : > { %v1815_v63 = vadd.f32 %v1711_v19, %v1367_v35  ;;  %v1199_v37 = vsel %vm4024_vm14, %v1196_v58, %v1193_v2  ;;  %v2341_v48 = vpop.eup %2340  ;;  %2350 = vpow2.f32 %v407_v9  ;;  %v675_v38 = vmul.f32 %v4001_v23, %v674_v31 }
 0x1bb   : > { %v1720_v47 = vsel %vm4037_vm15, %v1717_v4, %v1714_v7  ;;  %v1434_v43 = vsub.f32 0.0, %v1402_v12  ;;  %v1271_v32 = vadd.f32 %v1199_v37, %v823_v6  ;;  %v1200_v34 = vadd.f32 1.0, %v2341_v48 }
 0x1bc   : > { %1847 = vst [vmem:[%s3139_s19 + $0xb0] sm:$0xff] %v1815_v63  ;;  %v1816_v35 = vadd.f32 %v1720_v47, %v1368_v60  ;;  %vm4057_vm0 = vcmp.lt.f32.partialorder %v676_v57, 0.0004427343  ;;  %v1203_v21 = vmul.f32 -0.5, %v2341_v48  ;;  %v684_v27 = vmul.f32 %v4007_v22, %v683_v40 }
 0x1bd   : > { %v2343_v10 = vpop.eup %2342  ;;  %v1491_v54 = vmul.f32 1.442695, %v1434_v43  ;;  %v1305_v52 = vmul.f32 %v2743_v46, %v1271_v32  ;;  %2352 = vlog2.f32 %v1200_v34  ;;  %v279_v13 = vmax.f32 %v3944_v49, 0.0 }
 0x1be   : > { %v2345_v62 = vpop.eup %2344  ;;  %1848 = vst [vmem:[%s3139_s19 + $0xb8] sm:$0xff] %v1816_v35  ;;  %v1721_v61 = vadd.f32 1.0, %v2343_v10  ;;  %vm686_vm1 = vcmp.lt.f32.partialorder %v685_v3, 0.0004427343  ;;  %v1724_v20 = vmul.f32 -0.5, %v2343_v10  ;;  %v1204_v50 = vadd.f32 1.0, %v1203_v21 }
 0x1bf   : > { %v2347_v6 = vpop.eup %2346  ;;  %2354 = vpow2.f32 %v1491_v54  ;;  %v4062_v16 = vadd.f32 %v2752_v56, %v1305_v52  ;;  %v672_v0 = vmul.f32 0.6931472, %v2345_v62  ;;  %v1206_v41 = vand.u32 2147483647, %v2341_v48 }
 0x1c0   : > { %2356 = vlog2.f32 %v1721_v61  ;;  %v681_v24 = vmul.f32 0.6931472, %v2347_v6  ;;  %v1725_v51 = vadd.f32 1.0, %v1724_v20  ;;  %v1727_v49 = vand.u32 2147483647, %v2343_v10 }
 0x1c1   : > { %v1403_v23 = vand.u32 2147483647, %v4062_v16  ;;  %v678_v28 = vsel %vm4057_vm0, %v675_v38, %v672_v0  ;;  %v824_v4 = vmax.f32 %v3964_v39, 0.0  ;;  %v1205_v2 = vmul.f32 %v2341_v48, %v1204_v50 }
 0x1c2   : > { %v726_v44 = vadd.f32 %v678_v28, %v278_v55  ;;  %v687_v8 = vsel %vm686_vm1, %v684_v27, %v681_v24  ;;  %vm4072_vm2 = vcmp.lt.f32.partialorder %v1206_v41, 0.0004427343  ;;  %v1726_v26 = vmul.f32 %v2343_v10, %v1725_v51 }
 0x1c3   : > { %v1435_v25 = vsub.f32 0.0, %v1403_v23  ;;  %v2349_v29 = vpop.eup %2348  ;;  %v727_v58 = vadd.f32 %v687_v8, %v279_v13  ;;  %v1369_v39 = vmax.f32 %v3992_v15, 0.0  ;;  %vm1728_vm3 = vcmp.lt.f32.partialorder %v1727_v49, 0.0004427343 }
 0x1c4   : > { %v2351_v22 = vpop.eup %2350  ;;  %v1209_v45 = vadd.f32 1.0, %v2349_v29  ;;  %v760_v17 = vmul.f32 %v2732_v36, %v726_v44  ;;  %v1212_v19 = vmul.f32 -0.5, %v2349_v29  ;;  %v1215_v54 = vand.u32 2147483647, %v2349_v29 }
 0x1c5   : > { %v1493_v14 = vmul.f32 1.442695, %v1435_v25  ;;  %v761_v5 = vmul.f32 %v2732_v36, %v727_v58  ;;  %v688_v1 = vadd.f32 1.0, %v2351_v22  ;;  %v691_v37 = vmul.f32 -0.5, %v2351_v22 }
 0x1c6   : > { %v4077_v60 = vadd.f32 %v2737_v42, %v760_v17  ;;  %v1213_v43 = vadd.f32 1.0, %v1212_v19  ;;  %v694_v61 = vand.u32 2147483647, %v2351_v22  ;;  %v825_v33 = vmax.f32 %v4017_v18, 0.0 }
 0x1c7   : > { %2358 = vpow2.f32 %v1493_v14  ;;  %v2353_v9 = vpop.eup %2352  ;;  %v4080_v7 = vadd.f32 %v2737_v42, %v761_v5  ;;  %v692_v52 = vadd.f32 1.0, %v691_v37  ;;  %v280_v6 = vmax.f32 %v3979_v11, 0.0 }
 0x1c8   : > { %2360 = vlog2.f32 %v1209_v45  ;;  %v1202_v63 = vmul.f32 0.6931472, %v2353_v9  ;;  %v858_v48 = vand.u32 2147483647, %v4077_v60  ;;  %v1214_v0 = vmul.f32 %v2349_v29, %v1213_v43 }
 0x1c9   : > { %v2355_v53 = vpop.eup %2354  ;;  %2362 = vlog2.f32 %v688_v1  ;;  %v859_v3 = vand.u32 2147483647, %v4080_v7  ;;  %vm4094_vm4 = vcmp.lt.f32.partialorder %v1215_v54, 0.0004427343  ;;  %v693_v25 = vmul.f32 %v2351_v22, %v692_v52 }
 0x1ca   : > { %v2357_v12 = vpop.eup %2356  ;;  %v1730_v57 = vadd.f32 1.0, %v2355_v53  ;;  %v1208_v40 = vsel %vm4072_vm2, %v1205_v2, %v1202_v63  ;;  %v1733_v35 = vmul.f32 -0.5, %v2355_v53  ;;  %v890_v34 = vsub.f32 0.0, %v858_v48 }
 0x1cb   : > { %v1723_v31 = vmul.f32 0.6931472, %v2357_v12  ;;  %v1272_v47 = vadd.f32 %v1208_v40, %v824_v4  ;;  %v891_v62 = vsub.f32 0.0, %v859_v3  ;;  %v1736_v23 = vand.u32 2147483647, %v2355_v53 }
 0x1cc   : > { %2364 = vlog2.f32 %v1730_v57  ;;  %v951_v55 = vmul.f32 1.442695, %v890_v34  ;;  %v1734_v27 = vadd.f32 1.0, %v1733_v35  ;;  %vm695_vm5 = vcmp.lt.f32.partialorder %v694_v61, 0.0004427343 }
 0x1cd   : > { %v1729_v32 = vsel %vm1728_vm3, %v1726_v26, %v1723_v31  ;;  %v1306_v15 = vmul.f32 %v2743_v46, %v1272_v47  ;;  %v953_v13 = vmul.f32 1.442695, %v891_v62  ;;  %v1370_v14 = vmax.f32 %v4032_v59, 0.0 }
 0x1ce   : > { %v1817_v10 = vadd.f32 %v1729_v32, %v1369_v39  ;;  %2366 = vpow2.f32 %v951_v55  ;;  %v1735_v18 = vmul.f32 %v2355_v53, %v1734_v27  ;;  %vm1737_vm6 = vcmp.lt.f32.partialorder %v1736_v23, 0.0004427343 }
 0x1cf   : > { %v4090_v38 = vadd.f32 %v2752_v56, %v1306_v15  ;;  %2368 = vpow2.f32 %v953_v13  ;;  %v1371_v57 = vmax.f32 %v4062_v16, 0.0 }
 0x1d0   : > { %1849 = vst [vmem:[%s3139_s19 + $0xc0] sm:$0xff] %v1817_v10 }
 0x1d1   : > { %v2359_v21 = vpop.eup %2358  ;;  %v1404_v44 = vand.u32 2147483647, %v4090_v38 }
 0x1d2   : > { %v2361_v20 = vpop.eup %2360  ;;  %v1739_v24 = vadd.f32 1.0, %v2359_v21  ;;  %v1742_v29 = vmul.f32 -0.5, %v2359_v21  ;;  %v1745_v19 = vand.u32 2147483647, %v2359_v21 }
 0x1d3   : > { %v2363_v50 = vpop.eup %2362  ;;  %v1211_v8 = vmul.f32 0.6931472, %v2361_v20  ;;  %v1436_v41 = vsub.f32 0.0, %v1404_v44  ;;  %v827_v20 = vmax.f32 %v4080_v7, 0.0 }
 0x1d4   : > { %2370 = vlog2.f32 %v1739_v24  ;;  %v690_v11 = vmul.f32 0.6931472, %v2363_v50  ;;  %v1743_v2 = vadd.f32 1.0, %v1742_v29  ;;  %vm1746_vm7 = vcmp.lt.f32.partialorder %v1745_v19, 0.0004427343 }
 0x1d5   : > { %v1217_v58 = vsel %vm4094_vm4, %v1214_v0, %v1211_v8  ;;  %v1495_v17 = vmul.f32 1.442695, %v1436_v41 }
 0x1d6   : > { %v2365_v51 = vpop.eup %2364  ;;  %v1273_v22 = vadd.f32 %v1217_v58, %v825_v33  ;;  %v696_v45 = vsel %vm695_vm5, %v693_v25, %v690_v11  ;;  %v1744_v37 = vmul.f32 %v2359_v21, %v1743_v2  ;;  %v826_v21 = vmax.f32 %v4077_v60, 0.0 }
 0x1d7   : > { %v1732_v49 = vmul.f32 0.6931472, %v2365_v51  ;;  %v728_v5 = vadd.f32 %v696_v45, %v280_v6  ;;  %2372 = vpow2.f32 %v1495_v17  ;;  %v1372_v58 = vmax.f32 %v4090_v38, 0.0 }
 0x1d8   : > { %v1307_v1 = vmul.f32 %v2743_v46, %v1273_v22  ;;  %v2367_v59 = vpop.eup %2366 }
 0x1d9   : > { %v1738_v4 = vsel %vm1737_vm6, %v1735_v18, %v1732_v49  ;;  %v762_v9 = vmul.f32 %v2732_v36, %v728_v5  ;;  %v1218_v12 = vadd.f32 1.0, %v2367_v59  ;;  %v2369_v39 = vpop.eup %2368  ;;  %v1221_v43 = vmul.f32 -0.5, %v2367_v59 }
 0x1da   : > { %v1818_v30 = vadd.f32 %v1738_v4, %v1370_v14  ;;  %v4105_v53 = vadd.f32 %v2752_v56, %v1307_v1  ;;  %v1227_v48 = vadd.f32 1.0, %v2369_v39  ;;  %v1230_v34 = vmul.f32 -0.5, %v2369_v39 }
 0x1db   : > { %v4108_v26 = vadd.f32 %v2737_v42, %v762_v9  ;;  %2374 = vlog2.f32 %v1218_v12  ;;  %v1222_v15 = vadd.f32 1.0, %v1221_v43  ;;  %v1224_v52 = vand.u32 2147483647, %v2367_v59 }
 0x1dc   : > { %1850 = vst [vmem:[%s3139_s19 + $0xc8] sm:$0xff] %v1818_v30  ;;  %v1405_v63 = vand.u32 2147483647, %v4105_v53  ;;  %2376 = vlog2.f32 %v1227_v48  ;;  %v1231_v55 = vadd.f32 1.0, %v1230_v34  ;;  %v1233_v62 = vand.u32 2147483647, %v2369_v39 }
 0x1dd   : > { %v860_v31 = vand.u32 2147483647, %v4108_v26  ;;  %v1223_v33 = vmul.f32 %v2367_v59, %v1222_v15  ;;  %vm1225_vm8 = vcmp.lt.f32.partialorder %v1224_v52, 0.0004427343  ;;  %v828_v43 = vmax.f32 %v4108_v26, 0.0 }
 0x1de   : > { %v2371_v36 = vpop.eup %2370  ;;  %v1437_v40 = vsub.f32 0.0, %v1405_v63  ;;  %v1232_v0 = vmul.f32 %v2369_v39, %v1231_v55  ;;  %vm1234_vm9 = vcmp.lt.f32.partialorder %v1233_v62, 0.0004427343 }
 0x1df   : > { %v1741_v47 = vmul.f32 0.6931472, %v2371_v36  ;;  %v892_v42 = vsub.f32 0.0, %v860_v31  ;;  %v1373_v36 = vmax.f32 %v4105_v53, 0.0 }
 0x1e0   : > { %v1497_v32 = vmul.f32 1.442695, %v1437_v40 }
 0x1e1   : > { %v1747_v35 = vsel %vm1746_vm7, %v1744_v37, %v1741_v47  ;;  %v955_v3 = vmul.f32 1.442695, %v892_v42  ;;  %v2373_v16 = vpop.eup %2372 }
 0x1e2   : > { %v1819_v10 = vadd.f32 %v1747_v35, %v1371_v57  ;;  %2378 = vpow2.f32 %v1497_v32  ;;  %v1748_v54 = vadd.f32 1.0, %v2373_v16  ;;  %v1751_v61 = vmul.f32 -0.5, %v2373_v16 }
 0x1e3   : > { %2380 = vpow2.f32 %v955_v3  ;;  %v1754_v24 = vand.u32 2147483647, %v2373_v16 }
 0x1e4   : > { %1851 = vst [vmem:[%s3139_s19 + $0xd0] sm:$0xff] %v1819_v10  ;;  %2382 = vlog2.f32 %v1748_v54  ;;  %v1752_v23 = vadd.f32 1.0, %v1751_v61 }
 0x1e5   : > { %v2375_v6 = vpop.eup %2374  ;;  %vm1755_vm10 = vcmp.lt.f32.partialorder %v1754_v24, 0.0004427343 }
 0x1e6   : > { %v1220_v27 = vmul.f32 0.6931472, %v2375_v6  ;;  %v2377_v13 = vpop.eup %2376  ;;  %v1753_v51 = vmul.f32 %v2373_v16, %v1752_v23 }
 0x1e7   : > { %v1229_v25 = vmul.f32 0.6931472, %v2377_v13 }
 0x1e8   : > { %v1226_v28 = vsel %vm1225_vm8, %v1223_v33, %v1220_v27 }
 0x1e9   : > { %v1274_v44 = vadd.f32 %v1226_v28, %v826_v21  ;;  %v1235_v18 = vsel %vm1234_vm9, %v1232_v0, %v1229_v25 }
 0x1ea   : > { %v1275_v41 = vadd.f32 %v1235_v18, %v827_v20 }
 0x1eb   : > { %v1308_v29 = vmul.f32 %v2743_v46, %v1274_v44 }
 0x1ec   : > { %v2379_v50 = vpop.eup %2378  ;;  %v1309_v45 = vmul.f32 %v2743_v46, %v1275_v41 }
 0x1ed   : > { %v2381_v8 = vpop.eup %2380  ;;  %v1757_v11 = vadd.f32 1.0, %v2379_v50  ;;  %v1760_v14 = vmul.f32 -0.5, %v2379_v50  ;;  %v4120_v22 = vadd.f32 %v2752_v56, %v1308_v29  ;;  %v1763_v19 = vand.u32 2147483647, %v2379_v50 }
 0x1ee   : > { %v1236_v60 = vadd.f32 1.0, %v2381_v8  ;;  %v2383_v7 = vpop.eup %2382  ;;  %v1239_v17 = vmul.f32 -0.5, %v2381_v8  ;;  %v4125_v1 = vadd.f32 %v2752_v56, %v1309_v45  ;;  %v1242_v39 = vand.u32 2147483647, %v2381_v8 }
 0x1ef   : > { %2384 = vlog2.f32 %v1757_v11  ;;  %v1750_v49 = vmul.f32 0.6931472, %v2383_v7  ;;  %v1406_v5 = vand.u32 2147483647, %v4120_v22  ;;  %v1761_v2 = vadd.f32 1.0, %v1760_v14 }
 0x1f0   : > { %2386 = vlog2.f32 %v1236_v60  ;;  %v1407_v30 = vand.u32 2147483647, %v4125_v1  ;;  %v1240_v59 = vadd.f32 1.0, %v1239_v17  ;;  %vm1764_vm11 = vcmp.lt.f32.partialorder %v1763_v19, 0.0004427343 }
 0x1f1   : > { %v1756_v38 = vsel %vm1755_vm10, %v1753_v51, %v1750_v49  ;;  %v1438_v9 = vsub.f32 0.0, %v1406_v5  ;;  %v1762_v57 = vmul.f32 %v2379_v50, %v1761_v2  ;;  %vm1243_vm12 = vcmp.lt.f32.partialorder %v1242_v39, 0.0004427343 }
 0x1f2   : > { %v1820_v4 = vadd.f32 %v1756_v38, %v1372_v58  ;;  %v1439_v12 = vsub.f32 0.0, %v1407_v30  ;;  %v1241_v40 = vmul.f32 %v2381_v8, %v1240_v59  ;;  %v1375_v28 = vmax.f32 %v4125_v1, 0.0 }
 0x1f3   : > { %v1499_v63 = vmul.f32 1.442695, %v1438_v9 }
 0x1f4   : > { %1852 = vst [vmem:[%s3139_s19 + $0xd8] sm:$0xff] %v1820_v4  ;;  %v1501_v37 = vmul.f32 1.442695, %v1439_v12 }
 0x1f5   : > { %2388 = vpow2.f32 %v1499_v63 }
 0x1f6   : > { %2390 = vpow2.f32 %v1501_v37 }
 0x1f9   : > { %v2385_v31 = vpop.eup %2384 }
 0x1fa   : > { %v2387_v48 = vpop.eup %2386  ;;  %v1759_v47 = vmul.f32 0.6931472, %v2385_v31 }
 0x1fb   : > { %v1238_v42 = vmul.f32 0.6931472, %v2387_v48 }
 0x1fc   : > { %v1765_v32 = vsel %vm1764_vm11, %v1762_v57, %v1759_v47 }
 0x1fd   : > { %v1821_v35 = vadd.f32 %v1765_v32, %v1373_v36  ;;  %v1244_v34 = vsel %vm1243_vm12, %v1241_v40, %v1238_v42 }
 0x1fe   : > { %v1276_v3 = vadd.f32 %v1244_v34, %v828_v43 }
 0x1ff   : > { %1853 = vst [vmem:[%s3139_s19 + $0xe0] sm:$0xff] %v1821_v35  ;;  %v2389_v16 = vpop.eup %2388 }
 0x200   : > { %v1310_v10 = vmul.f32 %v2743_v46, %v1276_v3  ;;  %v1766_v53 = vadd.f32 1.0, %v2389_v16  ;;  %v2391_v54 = vpop.eup %2390  ;;  %v1769_v62 = vmul.f32 -0.5, %v2389_v16  ;;  %v1772_v21 = vand.u32 2147483647, %v2389_v16 }
 0x201   : > { %v1775_v55 = vadd.f32 1.0, %v2391_v54  ;;  %v1778_v26 = vmul.f32 -0.5, %v2391_v54  ;;  %v1781_v0 = vand.u32 2147483647, %v2391_v54 }
 0x202   : > { %v1344_v15 = vadd.f32 %v2752_v56, %v1310_v10  ;;  %2392 = vlog2.f32 %v1766_v53  ;;  %v1770_v6 = vadd.f32 1.0, %v1769_v62  ;;  %v1374_v56 = vmax.f32 %v4120_v22, 0.0 }
 0x203   : > { %2394 = vlog2.f32 %v1775_v55  ;;  %v1779_v27 = vadd.f32 1.0, %v1778_v26  ;;  %vm1773_vm13 = vcmp.lt.f32.partialorder %v1772_v21, 0.0004427343  ;;  %vm1782_vm14 = vcmp.lt.f32.partialorder %v1781_v0, 0.0004427343 }
 0x204   : > { %v1408_v52 = vand.u32 2147483647, %v1344_v15  ;;  %v1771_v46 = vmul.f32 %v2389_v16, %v1770_v6  ;;  %v1376_v14 = vmax.f32 %v1344_v15, 0.0 }
 0x205   : > { %v1780_v23 = vmul.f32 %v2391_v54, %v1779_v27 }
 0x206   : > { %v1440_v61 = vsub.f32 0.0, %v1408_v52 }
 0x208   : > { %v1503_v33 = vmul.f32 1.442695, %v1440_v61 }
 0x20a   : > { %2396 = vpow2.f32 %v1503_v33 }
 0x20c   : > { %v2393_v13 = vpop.eup %2392 }
 0x20d   : > { %v1768_v20 = vmul.f32 0.6931472, %v2393_v13  ;;  %v2395_v24 = vpop.eup %2394 }
 0x20e   : > { %v1777_v50 = vmul.f32 0.6931472, %v2395_v24 }
 0x20f   : > { %v1774_v25 = vsel %vm1773_vm13, %v1771_v46, %v1768_v20 }
 0x210   : > { %v1822_v44 = vadd.f32 %v1774_v25, %v1374_v56  ;;  %v1783_v11 = vsel %vm1782_vm14, %v1780_v23, %v1777_v50 }
 0x211   : > { %v1823_v18 = vadd.f32 %v1783_v11, %v1375_v28 }
 0x212   : > { %1854 = vst [vmem:[%s3139_s19 + $0xe8] sm:$0xff] %v1822_v44 }
 0x213   : > { %1855 = vst [vmem:[%s3139_s19 + $0xf0] sm:$0xff] %v1823_v18 }
 0x214   : > { %v2397_v8 = vpop.eup %2396 }
 0x215   : > { %v1784_v29 = vadd.f32 1.0, %v2397_v8  ;;  %v1787_v41 = vmul.f32 -0.5, %v2397_v8  ;;  %v1790_v58 = vand.u32 2147483647, %v2397_v8 }
 0x217   : > { %2398 = vlog2.f32 %v1784_v29  ;;  %v1788_v60 = vadd.f32 1.0, %v1787_v41  ;;  %vm1791_vm15 = vcmp.lt.f32.partialorder %v1790_v58, 0.0004427343 }
 0x219   : > { %v1789_v51 = vmul.f32 %v2397_v8, %v1788_v60 }
 0x221   : > { %v2399_v7 = vpop.eup %2398 }
 0x222   : > { %v1786_v22 = vmul.f32 0.6931472, %v2399_v7 }
 0x224   : > { %v1792_v45 = vsel %vm1791_vm15, %v1789_v51, %v1786_v22 }
 0x225   : > { %v1824_v49 = vadd.f32 %v1792_v45, %v1376_v14 }
 0x227   : > { %1856 = vst [vmem:[%s3139_s19 + $0xf8] sm:$0xff] %v1824_v49 }
 0x228   : > { %2467 = shalt.err (!%p2464_p12)
}
 0x229   : > { %s2468_s11 = scalar_lea.hbm %s4143_s28, 4096  ;;  %s2472_s12 = scalar_lea.hbm %s4192_s3, 8192 }
 0x22a   : > { %p2469_p0 = scmp.ne.s32.totalorder %s4143_s28, %s2468_s11  ;;  %p2473_p5 = scmp.lt.u32.totalorder %s4143_s28, %s4192_s3 }
 0x22b   : > { %p2474_p11 = scmp.lt.u32.totalorder %s2472_s12, %s2468_s11  ;;  %p2476_p2 = scmp.lt.u32.totalorder %s2468_s11, %s4143_s28 }
 0x22c   : > { %p2470_p1 = pnand %p2469_p0, %p4370_p7 }
 0x22d   : > { %p2475_p13 = por %p2474_p11, %p2473_p5 }
 0x22e   : > { %p2471_p3 = pneg %p2470_p1 }
 0x22f   : > { %p2477_p8 = por %p2476_p2, %p2475_p13 }
 0x231   : > { %p2478_p9 = pnand %p2477_p8, %p2471_p3 }
 0x233   : > { %2481 = shalt.err (!%p2478_p9)
}
 0x234   : > { %s2530_s15 = smov 128   ;;  %s2531_s16 = smov 8  }
 0x235   : > { %1966 = dma.vmem_to_hbm [thread:$0]  (%p4370_p7), %s4145_s0, 4096, %s4143_s28, %s1858_s30, %s2530_s15, %s2530_s15, %s2531_s16  }
 0x236 PF: > { %s1886_s18 = sand.u32 1, %s2510_s1   ;;  %p4371_p4 = scmp.ne.s32.totalorder %s4198_s6, 0 }
 0x237   : > { %p4372_p6 = scmp.ge.s32.totalorder %s2522_s23, 2  ;;  %s1887_s19 = scalar_lea.sflag [#allocation7], %s1886_s18 }
 0x239   : > { %p1973_p10 = pnand %p4372_p6, %p4371_p4 }
 0x23b   : > { %2505 = dma.done.wait (!%p1973_p10), %s1887_s19, 4096  }
 0x23c   : > { %2507 = vsyncadd (!%p1973_p10), %s1887_s19, 4294963200  ;;  %p26_p12 = scmp.ge.s32.totalorder %s2583_s26, 4   ;;  %s4373_s1 = smov %s2514_s21 }
 0x23d   : > { %s4374_s21 = smov %s2518_s22  ;;  %s4375_s22 = smov %s2595_s29 }
 0x23e   : > { %s4376_s23 = smov %s2583_s26  ;;  %28 = sbr.rel (!%p26_p12) target bundleno = 30 (0x1e), region = 69 }
 0x245   :  { %1892 = vsyncpa [#allocation6], 1 }
 0x246   :  { %1894 = vsyncpa [#allocation6 + $0x1], 1 }
 0x247   :  { %1895 = vsyncpa [#allocation7], 1 }
 0x248   :  { %1897 = vsyncpa [#allocation7 + $0x1], 1 }

</bundles_post_ra>
